<compile_context>
chip_gen: v7x
topology: tpu7x:2x2x1
jax: 0.10.0
libtpu: 0.0.40
codegen_flags: <defaults>
</compile_context>

<pallas_src>
import jax
import jax.numpy as jnp
from jax.experimental import pallas as pl
from jax.experimental.pallas import tpu as pltpu

F32 = jnp.float32
BF16 = jnp.bfloat16


# ----------------------------- small helpers ----------------------------------

def _round_up(v, m):
    return ((v + m - 1) // m) * m


def _silu(x):
    return x * jax.nn.sigmoid(x)


def _layernorm(v, g, b, eps=1e-5):
    """Plain two-pass LayerNorm over the last dim (used in the wrapper for LN1)."""
    mu = v.mean(-1, keepdims=True)
    xc = v - mu
    var = (xc * xc).mean(-1, keepdims=True)
    return xc * jax.lax.rsqrt(var + eps) * g + b


def _masked_layernorm(h, gamma, beta, mask, inv_c, eps=1e-5):
    """LayerNorm over the first `1/inv_c` channels of a lane-padded (rows, 128k) block.

    mask is a (1, C_pad) f32 row with ones on the real channels; the statistics are
    computed only over masked entries (robust even if padded lanes are non-zero).
    Padded output lanes are exactly zero (mask * ... * gamma + beta with zero padding).
    """
    hm = h * mask
    mu = jnp.sum(hm, axis=-1, keepdims=True) * inv_c
    xc = (h - mu) * mask
    var = jnp.sum(xc * xc, axis=-1, keepdims=True) * inv_c
    return xc * jax.lax.rsqrt(var + eps) * gamma + beta


def _vmem_limit_bytes():
    """Per-generation scoped-VMEM limit: ~40 MiB on v7x (64 MiB), ~100 MiB on v5e/v6e."""
    try:
        cap = pltpu.get_tpu_info().vmem_capacity_bytes
    except Exception:
        cap = 128 * 1024 * 1024
    return max(32 * 1024 * 1024, min(cap - 24 * 1024 * 1024, 100 * 1024 * 1024))


# ------------------------------- main wrapper ----------------------------------

def conditional_graph_conv_block(x, t_emb, c_emb, adj_norm, params, *,
                                 row_tile=None, k_tile=None, force_tiled=False):
    """x: [N, Cin] f32, t_emb: [Tc], c_emb: [Cc], adj_norm: [N, N] dense normalized adjacency."""
    n, c_in = x.shape
    c_out = params["w1"].shape[1]
    eps = 1e-5

    # ---- padded / aligned sizes (lane-dense 128 everywhere) ----
    c_in_p = _round_up(c_in, 128)
    c_out_p = _round_up(c_out, 128)
    n_128 = _round_up(n, 128)

    vmem_budget = _vmem_limit_bytes()
    big_vmem = vmem_budget >= 64 * 1024 * 1024        # v5e / v6e class budget
    tn = _round_up(row_tile, 128) if row_tile else (512 if big_vmem else 256)
    tk = _round_up(k_tile, 128) if k_tile else (512 if big_vmem else 256)
    tn = min(tn, n_128)
    tk = min(tk, n_128)

    # Fused fast path if the whole padded problem fits a small slice of VMEM.
    fused_bytes = 2 * n_128 * n_128 + 20 * n_128 * c_out_p + 6 * c_out_p * c_out_p
    use_fused = (not force_tiled) and fused_bytes <= vmem_budget // 3

    n_p = n_128 if use_fused else _round_up(n_128, max(tn, tk))
    inv_cout = 1.0 / float(c_out)

    # ---- fold time/condition projections into per-layer biases (f32, outside kernel) ----
    bias1 = (params["b1"] + t_emb @ params["wt1"] + params["bt1"]
             + c_emb @ params["wc1"] + params["bc1"])
    bias2 = (params["b2"] + t_emb @ params["wt2"] + params["bt2"]
             + c_emb @ params["wc2"] + params["bc2"])

    # ---- hoist LN1 and fold W1:  P1 = LN1(x) @ W1  (so layer 1 is just A @ P1 + bias1) ----
    h0 = _layernorm(x.astype(F32), params["g1"], params["be1"], eps)
    p1 = h0 @ params["w1"].astype(F32)

    # ---- skip path (Linear if Cin != Cout, else identity) ----
    if "wsk" in params:
        wsk_raw, bsk_raw = params["wsk"], params["bsk"]
    else:
        wsk_raw = jnp.eye(c_in, c_out, dtype=F32)
        bsk_raw = jnp.zeros((c_out,), F32)

    # ---- padding helpers (with shape asserts: the padded-lane LN math relies on them) ----
    def pad2(a, rows, cols, dtype):
        assert a.ndim == 2, f"expected 2-D, got {a.shape}"
        return jnp.pad(a.astype(dtype), ((0, rows - a.shape[0]), (0, cols - a.shape[1])))

    def pad_row(v, cols, dtype=F32):
        assert v.ndim == 1, f"expected 1-D bias/scale, got {v.shape}"
        return jnp.pad(v.astype(dtype).reshape(1, -1), ((0, 0), (0, cols - v.shape[0])))

    adj_bf = pad2(adj_norm, n_p, n_p, BF16)          # dominant HBM stream -> bf16
    p1_bf = pad2(p1, n_p, c_out_p, BF16)
    x_bf = pad2(x, n_p, c_in_p, BF16)
    w2_bf = pad2(params["w2"], c_out_p, c_out_p, BF16)
    wsk_bf = pad2(wsk_raw, c_in_p, c_out_p, BF16)
    b1r = pad_row(bias1, c_out_p)
    b2r = pad_row(bias2, c_out_p)
    bskr = pad_row(bsk_raw, c_out_p)
    g2r = pad_row(params["g2"], c_out_p)
    be2r = pad_row(params["be2"], c_out_p)
    maskr = pad_row(jnp.ones((c_out,), F32), c_out_p)

    # =========================== fused single-call path ===========================
    if use_fused:
        def fused_kernel(adj_ref, p1_ref, x_ref, w2_ref, wsk_ref, b1_ref, b2_ref,
                         g2_ref, be2_ref, bsk_ref, mask_ref, o_ref):
            adj = adj_ref[...]
            # layer 1: SiLU(A @ P1 + bias1), then LN2, then fold W2
            h = jnp.dot(adj, p1_ref[...], preferred_element_type=F32) + b1_ref[...]
            h = _silu(h)                                   # dropout: eval-mode identity
            h = _masked_layernorm(h, g2_ref[...], be2_ref[...], mask_ref[...], inv_cout, eps)
            h2 = jnp.dot(h.astype(BF16), w2_ref[...], preferred_element_type=F32)
            # layer 2: SiLU(A @ H2 + bias2) + skip
            g = jnp.dot(adj, h2.astype(BF16), preferred_element_type=F32) + b2_ref[...]
            g = _silu(g)                                   # dropout: eval-mode identity
            skip = jnp.dot(x_ref[...], wsk_ref[...], preferred_element_type=F32) + bsk_ref[...]
            o_ref[...] = (g + skip).astype(o_ref.dtype)

        cost = pl.CostEstimate(
            flops=4 * n_p * n_p * c_out_p + 2 * n_p * c_out_p * c_out_p
                  + 2 * n_p * c_in_p * c_out_p,
            transcendentals=2 * n_p * c_out_p,
            bytes_accessed=2 * n_p * n_p + 6 * n_p * c_out_p + 4 * c_out_p * c_out_p,
        )
        out_pad = pl.pallas_call(
            fused_kernel,
            out_shape=jax.ShapeDtypeStruct((n_p, c_out_p), F32),
            compiler_params=pltpu.CompilerParams(vmem_limit_bytes=vmem_budget),
            cost_estimate=cost,
        )(adj_bf, p1_bf, x_bf, w2_bf, wsk_bf, b1r, b2r, g2r, be2r, bskr, maskr)
        return out_pad[:n, :c_out].astype(x.dtype)

    # ====================== large-N path: row + K tiled, two calls ======================
    grid = (n_p // tn, n_p // tk)
    cparams = pltpu.CompilerParams(
        dimension_semantics=("parallel", "arbitrary"),   # reduction axis last, never parallel
        vmem_limit_bytes=vmem_budget,
    )

    def const_spec(rows, cols):
        return pl.BlockSpec((rows, cols), lambda i, k: (0, 0))

    # ---- layer 1:  H2 = LN2( SiLU( A @ P1 + bias1 ) ) @ W2 ----
    def layer1_kernel(adj_ref, p1_ref, b1_ref, g2_ref, be2_ref, mask_ref, w2_ref,
                      o_ref, acc_ref):
        k = pl.program_id(1)

        @pl.when(k == 0)
        def _():
            acc_ref[...] = jnp.zeros_like(acc_ref)

        acc_ref[...] += jnp.dot(adj_ref[...], p1_ref[...], preferred_element_type=F32)

        @pl.when(k == pl.num_programs(1) - 1)
        def _():
            h = _silu(acc_ref[...] + b1_ref[...])          # dropout: eval-mode identity
            h = _masked_layernorm(h, g2_ref[...], be2_ref[...], mask_ref[...], inv_cout, eps)
            o_ref[...] = jnp.dot(h.astype(BF16), w2_ref[...],
                                 preferred_element_type=F32).astype(o_ref.dtype)

    cost1 = pl.CostEstimate(
        flops=2 * n_p * n_p * c_out_p + 2 * n_p * c_out_p * c_out_p,
        transcendentals=n_p * c_out_p + n_p,
        bytes_accessed=2 * n_p * n_p + 2 * n_p * c_out_p * (n_p // tn) + 4 * n_p * c_out_p,
    )
    h2 = pl.pallas_call(
        layer1_kernel,
        out_shape=jax.ShapeDtypeStruct((n_p, c_out_p), BF16),
        grid=grid,
        in_specs=[pl.BlockSpec((tn, tk), lambda i, k: (i, k)),
                  pl.BlockSpec((tk, c_out_p), lambda i, k: (k, 0)),
                  const_spec(1, c_out_p), const_spec(1, c_out_p), const_spec(1, c_out_p),
                  const_spec(1, c_out_p), const_spec(c_out_p, c_out_p)],
        out_specs=pl.BlockSpec((tn, c_out_p), lambda i, k: (i, 0)),
        scratch_shapes=[pltpu.VMEM((tn, c_out_p), F32)],
        compiler_params=cparams,
        cost_estimate=cost1,
    )(adj_bf, p1_bf, b1r, g2r, be2r, maskr, w2_bf)

    # ---- layer 2 + skip:  out = SiLU( A @ H2 + bias2 ) + x @ Wsk + bsk ----
    def layer2_kernel(adj_ref, h2_ref, b2_ref, x_ref, wsk_ref, bsk_ref, o_ref, acc_ref):
        k = pl.program_id(1)

        @pl.when(k == 0)
        def _():
            acc_ref[...] = jnp.zeros_like(acc_ref)

        acc_ref[...] += jnp.dot(adj_ref[...], h2_ref[...], preferred_element_type=F32)

        @pl.when(k == pl.num_programs(1) - 1)
        def _():
            g = _silu(acc_ref[...] + b2_ref[...])          # dropout: eval-mode identity
            skip = jnp.dot(x_ref[...], wsk_ref[...], preferred_element_type=F32) + bsk_ref[...]
            o_ref[...] = (g + skip).astype(o_ref.dtype)

    cost2 = pl.CostEstimate(
        flops=2 * n_p * n_p * c_out_p + 2 * n_p * c_in_p * c_out_p,
        transcendentals=n_p * c_out_p,
        bytes_accessed=2 * n_p * n_p + 2 * n_p * c_out_p * (n_p // tn)
                       + 2 * n_p * c_in_p + 4 * n_p * c_out_p,
    )
    out_pad = pl.pallas_call(
        layer2_kernel,
        out_shape=jax.ShapeDtypeStruct((n_p, c_out_p), F32),
        grid=grid,
        in_specs=[pl.BlockSpec((tn, tk), lambda i, k: (i, k)),
                  pl.BlockSpec((tk, c_out_p), lambda i, k: (k, 0)),
                  const_spec(1, c_out_p),
                  pl.BlockSpec((tn, c_in_p), lambda i, k: (i, 0)),
                  const_spec(c_in_p, c_out_p), const_spec(1, c_out_p)],
        out_specs=pl.BlockSpec((tn, c_out_p), lambda i, k: (i, 0)),
        scratch_shapes=[pltpu.VMEM((tn, c_out_p), F32)],
        compiler_params=cparams,
        cost_estimate=cost2,
    )(adj_bf, h2, b2r, x_bf, wsk_bf, bskr)

    return out_pad[:n, :c_out].astype(x.dtype)


# ------------------------- glue: graph + params + reference ----------------------

def build_gcn_adj(edge_index, num_nodes, dtype=F32):
    """Dense A_hat = D^-1/2 (A + I) D^-1/2, matching PyG GCNConv's default gcn_norm."""
    src, dst = edge_index
    a = jnp.zeros((num_nodes, num_nodes), dtype).at[dst, src].add(1.0)
    a = a + jnp.eye(num_nodes, dtype=dtype)
    deg = jnp.sum(a, axis=1)
    dinv = jnp.where(deg > 0, jax.lax.rsqrt(deg), 0.0)
    return dinv[:, None] * a * dinv[None, :]


def init_params(key, cin, cout, tc, cc, dtype=F32):
    ks = jax.random.split(key, 14)
    s = 0.1
    return {
        "g1": jnp.ones((cin,), dtype), "be1": jnp.zeros((cin,), dtype),
        "g2": jnp.ones((cout,), dtype), "be2": jnp.zeros((cout,), dtype),
        "w1": s * jax.random.normal(ks[0], (cin, cout), dtype),
        "b1": s * jax.random.normal(ks[1], (cout,), dtype),
        "wt1": s * jax.random.normal(ks[2], (tc, cout), dtype),
        "bt1": s * jax.random.normal(ks[3], (cout,), dtype),
        "wc1": s * jax.random.normal(ks[4], (cc, cout), dtype),
        "bc1": s * jax.random.normal(ks[5], (cout,), dtype),
        "w2": s * jax.random.normal(ks[6], (cout, cout), dtype),
        "b2": s * jax.random.normal(ks[7], (cout,), dtype),
        "wt2": s * jax.random.normal(ks[8], (tc, cout), dtype),
        "bt2": s * jax.random.normal(ks[9], (cout,), dtype),
        "wc2": s * jax.random.normal(ks[10], (cc, cout), dtype),
        "bc2": s * jax.random.normal(ks[11], (cout,), dtype),
        "wsk": s * jax.random.normal(ks[12], (cin, cout), dtype),
        "bsk": s * jax.random.normal(ks[13], (cout,), dtype),
    }


def reference_forward(x, t_emb, c_emb, adj, p, eps=1e-5):
    """Pure-JAX f32 reference mirroring the PyTorch module (eval mode, dropout=identity)."""
    h = _layernorm(x, p["g1"], p["be1"], eps)
    h = (adj @ h @ p["w1"] + p["b1"]
         + t_emb @ p["wt1"] + p["bt1"] + c_emb @ p["wc1"] + p["bc1"])
    h = _silu(h)
    h = _layernorm(h, p["g2"], p["be2"], eps)
    h = (adj @ h @ p["w2"] + p["b2"]
         + t_emb @ p["wt2"] + p["bt2"] + c_emb @ p["wc2"] + p["bc2"])
    h = _silu(h)
    skip = x @ p["wsk"] + p["bsk"]
    return h + skip


def ring_edge_index(n):
    src = jnp.concatenate([jnp.arange(n), (jnp.arange(n) + 1) % n])
    dst = jnp.concatenate([(jnp.arange(n) + 1) % n, jnp.arange(n)])
    return jnp.stack([src, dst], axis=0)


# ------------------------------------ main ---------------------------------------

if __name__ == "__main__":
    CIN, COUT, TC, CC = 16, 32, 8, 12
    key = jax.random.PRNGKey(0)
    kx, kt, kc, kp = jax.random.split(key, 4)

    t_emb = jax.random.normal(kt, (TC,), F32)
    c_emb = jax.random.normal(kc, (CC,), F32)
    params = init_params(kp, CIN, COUT, TC, CC)

    # ---- small graph (exercises the fused single-call path) ----
    N = 16
    x = jax.random.normal(kx, (N, CIN), F32)
    adj = build_gcn_adj(ring_edge_index(N), N)

    out = jax.block_until_ready(conditional_graph_conv_block(x, t_emb, c_emb, adj, params))
    ref = reference_forward(x, t_emb, c_emb, adj, params)
    assert out.shape == (N, COUT)
    # bf16 matmul operands (f32 accumulation) vs. pure-f32 reference -> loose-ish tolerance
    assert jnp.allclose(out, ref, rtol=5e-2, atol=5e-2), (
        f"fused path mismatch, max abs err {jnp.max(jnp.abs(out - ref))}")

    # ---- larger graph (exercises the row + K tiled accumulator path) ----
    N2 = 200
    x2 = jax.random.normal(jax.random.fold_in(key, 1), (N2, CIN), F32)
    adj2 = build_gcn_adj(ring_edge_index(N2), N2)
    out2 = jax.block_until_ready(conditional_graph_conv_block(
        x2, t_emb, c_emb, adj2, params, force_tiled=True, row_tile=128, k_tile=128))
    ref2 = reference_forward(x2, t_emb, c_emb, adj2, params)
    assert out2.shape == (N2, COUT)
    assert jnp.allclose(out2, ref2, rtol=5e-2, atol=5e-2), (
        f"tiled path mismatch, max abs err {jnp.max(jnp.abs(out2 - ref2))}")

    print("KERNEL_OK")
</pallas_src>

<mosaic_0001>
module attributes {stable_mosaic.version = 11 : i64} {
  func.func @fused_kernel(%arg0: memref<128x128xbf16, #tpu.memory_space<vmem>>, %arg1: memref<128x128xbf16, #tpu.memory_space<vmem>>, %arg2: memref<128x128xbf16, #tpu.memory_space<vmem>>, %arg3: memref<128x128xbf16, #tpu.memory_space<vmem>>, %arg4: memref<128x128xbf16, #tpu.memory_space<vmem>>, %arg5: memref<1x128xf32, #tpu.memory_space<vmem>>, %arg6: memref<1x128xf32, #tpu.memory_space<vmem>>, %arg7: memref<1x128xf32, #tpu.memory_space<vmem>>, %arg8: memref<1x128xf32, #tpu.memory_space<vmem>>, %arg9: memref<1x128xf32, #tpu.memory_space<vmem>>, %arg10: memref<1x128xf32, #tpu.memory_space<vmem>>, %arg11: memref<128x128xf32, #tpu.memory_space<vmem>>) attributes {dimension_semantics = [], scalar_prefetch = 0 : i64, scratch_operands = 0 : i64, tpu.core_type = #tpu.core_type<tc>} {
    %c0 = arith.constant 0 : index
    %c0_0 = arith.constant 0 : index
    %0 = vector.load %arg0[%c0, %c0_0] : memref<128x128xbf16, #tpu.memory_space<vmem>>, vector<128x128xbf16>
    %c0_1 = arith.constant 0 : index
    %c0_2 = arith.constant 0 : index
    %1 = vector.load %arg1[%c0_1, %c0_2] : memref<128x128xbf16, #tpu.memory_space<vmem>>, vector<128x128xbf16>
    %cst = arith.constant dense<0.000000e+00> : vector<128x128xf32>
    %2 = tpu.matmul %0, %1, %cst {dimension_numbers = #tpu.dot_dimension_numbers<[1], [0], [0], [1], [0, 0, 1, 1], [], []>} : vector<128x128xbf16>, vector<128x128xbf16>, vector<128x128xf32> -> vector<128x128xf32>
    %c0_3 = arith.constant 0 : index
    %c0_4 = arith.constant 0 : index
    %3 = vector.load %arg5[%c0_3, %c0_4] : memref<1x128xf32, #tpu.memory_space<vmem>>, vector<1x128xf32>
    %4 = vector.broadcast %3 : vector<1x128xf32> to vector<128x128xf32>
    %5 = arith.addf %2, %4 : vector<128x128xf32>
    %6 = arith.negf %5 : vector<128x128xf32>
    %7 = math.exp %6 : vector<128x128xf32>
    %cst_5 = arith.constant 1.000000e+00 : f32
    %8 = vector.broadcast %cst_5 : f32 to vector<128x128xf32>
    %9 = arith.addf %8, %7 : vector<128x128xf32>
    %10 = arith.divf %8, %9 : vector<128x128xf32>
    %11 = arith.mulf %5, %10 : vector<128x128xf32>
    %c0_6 = arith.constant 0 : index
    %c0_7 = arith.constant 0 : index
    %12 = vector.load %arg7[%c0_6, %c0_7] : memref<1x128xf32, #tpu.memory_space<vmem>>, vector<1x128xf32>
    %c0_8 = arith.constant 0 : index
    %c0_9 = arith.constant 0 : index
    %13 = vector.load %arg8[%c0_8, %c0_9] : memref<1x128xf32, #tpu.memory_space<vmem>>, vector<1x128xf32>
    %c0_10 = arith.constant 0 : index
    %c0_11 = arith.constant 0 : index
    %14 = vector.load %arg10[%c0_10, %c0_11] : memref<1x128xf32, #tpu.memory_space<vmem>>, vector<1x128xf32>
    %15 = vector.broadcast %14 : vector<1x128xf32> to vector<128x128xf32>
    %16 = arith.mulf %11, %15 : vector<128x128xf32>
    %cst_12 = arith.constant dense<0.000000e+00> : vector<128xf32>
    %17 = vector.multi_reduction <add>, %16, %cst_12 [1] : vector<128x128xf32> to vector<128xf32>
    %18 = vector.shape_cast %17 : vector<128xf32> to vector<128x1xf32>
    %cst_13 = arith.constant 3.125000e-02 : f32
    %19 = vector.broadcast %cst_13 : f32 to vector<128x1xf32>
    %20 = arith.mulf %18, %19 : vector<128x1xf32>
    %21 = vector.broadcast %20 : vector<128x1xf32> to vector<128x128xf32>
    %22 = arith.subf %11, %21 : vector<128x128xf32>
    %23 = vector.broadcast %14 : vector<1x128xf32> to vector<128x128xf32>
    %24 = arith.mulf %22, %23 : vector<128x128xf32>
    %25 = arith.mulf %24, %24 : vector<128x128xf32>
    %cst_14 = arith.constant dense<0.000000e+00> : vector<128xf32>
    %26 = vector.multi_reduction <add>, %25, %cst_14 [1] : vector<128x128xf32> to vector<128xf32>
    %27 = vector.shape_cast %26 : vector<128xf32> to vector<128x1xf32>
    %cst_15 = arith.constant 3.125000e-02 : f32
    %28 = vector.broadcast %cst_15 : f32 to vector<128x1xf32>
    %29 = arith.mulf %27, %28 : vector<128x1xf32>
    %cst_16 = arith.constant 9.99999974E-6 : f32
    %30 = vector.broadcast %cst_16 : f32 to vector<128x1xf32>
    %31 = arith.addf %29, %30 : vector<128x1xf32>
    %32 = math.rsqrt %31 : vector<128x1xf32>
    %33 = vector.broadcast %32 : vector<128x1xf32> to vector<128x128xf32>
    %34 = arith.mulf %24, %33 : vector<128x128xf32>
    %35 = vector.broadcast %12 : vector<1x128xf32> to vector<128x128xf32>
    %36 = arith.mulf %34, %35 : vector<128x128xf32>
    %37 = vector.broadcast %13 : vector<1x128xf32> to vector<128x128xf32>
    %38 = arith.addf %36, %37 : vector<128x128xf32>
    %39 = arith.truncf %38 : vector<128x128xf32> to vector<128x128xbf16>
    %c0_17 = arith.constant 0 : index
    %c0_18 = arith.constant 0 : index
    %40 = vector.load %arg3[%c0_17, %c0_18] : memref<128x128xbf16, #tpu.memory_space<vmem>>, vector<128x128xbf16>
    %cst_19 = arith.constant dense<0.000000e+00> : vector<128x128xf32>
    %41 = tpu.matmul %39, %40, %cst_19 {dimension_numbers = #tpu.dot_dimension_numbers<[1], [0], [0], [1], [0, 0, 1, 1], [], []>} : vector<128x128xbf16>, vector<128x128xbf16>, vector<128x128xf32> -> vector<128x128xf32>
    %42 = arith.truncf %41 : vector<128x128xf32> to vector<128x128xbf16>
    %cst_20 = arith.constant dense<0.000000e+00> : vector<128x128xf32>
    %43 = tpu.matmul %0, %42, %cst_20 {dimension_numbers = #tpu.dot_dimension_numbers<[1], [0], [0], [1], [0, 0, 1, 1], [], []>} : vector<128x128xbf16>, vector<128x128xbf16>, vector<128x128xf32> -> vector<128x128xf32>
    %c0_21 = arith.constant 0 : index
    %c0_22 = arith.constant 0 : index
    %44 = vector.load %arg6[%c0_21, %c0_22] : memref<1x128xf32, #tpu.memory_space<vmem>>, vector<1x128xf32>
    %45 = vector.broadcast %44 : vector<1x128xf32> to vector<128x128xf32>
    %46 = arith.addf %43, %45 : vector<128x128xf32>
    %47 = arith.negf %46 : vector<128x128xf32>
    %48 = math.exp %47 : vector<128x128xf32>
    %cst_23 = arith.constant 1.000000e+00 : f32
    %49 = vector.broadcast %cst_23 : f32 to vector<128x128xf32>
    %50 = arith.addf %49, %48 : vector<128x128xf32>
    %51 = arith.divf %49, %50 : vector<128x128xf32>
    %52 = arith.mulf %46, %51 : vector<128x128xf32>
    %c0_24 = arith.constant 0 : index
    %c0_25 = arith.constant 0 : index
    %53 = vector.load %arg2[%c0_24, %c0_25] : memref<128x128xbf16, #tpu.memory_space<vmem>>, vector<128x128xbf16>
    %c0_26 = arith.constant 0 : index
    %c0_27 = arith.constant 0 : index
    %54 = vector.load %arg4[%c0_26, %c0_27] : memref<128x128xbf16, #tpu.memory_space<vmem>>, vector<128x128xbf16>
    %cst_28 = arith.constant dense<0.000000e+00> : vector<128x128xf32>
    %55 = tpu.matmul %53, %54, %cst_28 {dimension_numbers = #tpu.dot_dimension_numbers<[1], [0], [0], [1], [0, 0, 1, 1], [], []>} : vector<128x128xbf16>, vector<128x128xbf16>, vector<128x128xf32> -> vector<128x128xf32>
    %c0_29 = arith.constant 0 : index
    %c0_30 = arith.constant 0 : index
    %56 = vector.load %arg9[%c0_29, %c0_30] : memref<1x128xf32, #tpu.memory_space<vmem>>, vector<1x128xf32>
    %57 = vector.broadcast %56 : vector<1x128xf32> to vector<128x128xf32>
    %58 = arith.addf %55, %57 : vector<128x128xf32>
    %59 = arith.addf %52, %58 : vector<128x128xf32>
    %c0_31 = arith.constant 0 : index
    %c0_32 = arith.constant 0 : index
    %60 = vector.load %arg11[%c0_31, %c0_32] : memref<128x128xf32, #tpu.memory_space<vmem>>, vector<128x128xf32>
    tpu.vector_store %arg11[%c0_31, %c0_32], %59 {strides = array<i32>} : memref<128x128xf32, #tpu.memory_space<vmem>>, vector<128x128xf32>,
    return
  }
}

</mosaic_0001>

<bundles_post_ra>
// kernel: tpu_custom_call.1
= control target key start
LH: loop header
LB: loop body
LE: loop exit
PB: predicated region body
PF: predicated region fallthrough
CT: control target
= control target key end

     0   :  { %16 = vsyncpa [#allocation3], 0  ;;  %s2932_s0 = inlined_call_operand.hbm [shape: bf16[128,128], index: 0, kind: input, shape index: {}]   ;;  %s2933_s1 = inlined_call_operand.hbm [shape: bf16[128,128], index: 1, kind: input, shape index: {}]   ;;  %s2934_s2 = inlined_call_operand.hbm [shape: bf16[128,128], index: 2, kind: input, shape index: {}]   ;;  %s2935_s3 = inlined_call_operand.hbm [shape: bf16[128,128], index: 3, kind: input, shape index: {}]   ;;  %s2936_s4 = inlined_call_operand.hbm [shape: bf16[128,128], index: 4, kind: input, shape index: {}]   ;;  %s2937_s5 = inlined_call_operand.hbm [shape: f32[1,128], index: 5, kind: input, shape index: {}]   ;;  %s2938_s6 = inlined_call_operand.hbm [shape: f32[1,128], index: 6, kind: input, shape index: {}]   ;;  %s2939_s7 = inlined_call_operand.hbm [shape: f32[1,128], index: 7, kind: input, shape index: {}]   ;;  %s2940_s8 = inlined_call_operand.hbm [shape: f32[1,128], index: 8, kind: input, shape index: {}]   ;;  %s2941_s9 = inlined_call_operand.hbm [shape: f32[1,128], index: 9, kind: input, shape index: {}]   ;;  %s2942_s10 = inlined_call_operand.hbm [shape: f32[1,128], index: 10, kind: input, shape index: {}]   ;;  %s2943_s11 = inlined_call_operand.hbm [shape: f32[128,128], index: 11, kind: output, shape index: {}]  }
   0x1   :  { %17 = vsyncpa [#allocation6], 0 }
   0x2   :  { %18 = vsyncpa [#allocation9], 0 }
   0x3   :  { %19 = vsyncpa [#allocation12], 0 }
   0x4   :  { %20 = vsyncpa [#allocation15], 0 }
   0x5   :  { %21 = vsyncpa [#allocation18], 0 }
   0x6   :  { %22 = vsyncpa [#allocation4], 0  ;;  %s2232_s17 = smov [#allocation5]   ;;  %s2233_s19 = smov [#allocation8]  }
   0x7   :  { %s40_s18 = sshll.u32 %s2232_s17, 4  ;;  %s64_s20 = sshll.u32 %s2233_s19, 4  ;;  %s41_s18 = int_to_ptr.vmem [resolvable:$true] %s40_s18  ;;  %s2308_s20 = int_to_ptr.vmem [resolvable:$true] %s64_s20 }
   0x8   :  { %s1954_s23 = scalar_lea.hbm %s2933_s1, 1024 }
   0x9   :  { %p1955_p0 = scmp.ne.s32.totalorder %s2933_s1, %s1954_s23  ;;  %p1958_p1 = scmp.lt.u32.totalorder %s1954_s23, %s2933_s1 }
   0xb   :  { %p1960_p2 = pnand %p1958_p1, %p1955_p0 }
   0xd   :  { %1963 = shalt.err (!%p1960_p2)
}
   0xe   :  { %s1964_s28 = scalar_lea.vmem %s41_s18, 1024  ;;  %p1969_p4 = scmp.lt.s32.totalorder %s41_s18, %s41_s18 }
   0xf   :  { %p1965_p3 = scmp.ne.s32.totalorder %s41_s18, %s1964_s28  ;;  %p1970_p5 = scmp.lt.s32.totalorder %s1964_s28, %s1964_s28 }
  0x11   :  { %p1971_p6 = por %p1970_p5, %p1969_p4 }
  0x13   :  { %p1972_p7 = pnand %p1971_p6, %p1965_p3 }
  0x15   :  { %1975 = shalt.err (!%p1972_p7)
}
  0x16   :  { %s2234_s29 = smov 64   ;;  %s2235_s30 = smov 4  }
  0x17   :  { %46 = dma.hbm_to_vmem [thread:$0]  %s2933_s1, 1024, %s41_s18, [#allocation6], %s2234_s29, %s2234_s29, %s2235_s30  }
  0x18   :  { %s1976_s16 = scalar_lea.hbm %s2935_s3, 1024 }
  0x19   :  { %p1977_p8 = scmp.ne.s32.totalorder %s2935_s3, %s1976_s16  ;;  %p1980_p9 = scmp.lt.u32.totalorder %s1976_s16, %s2935_s3 }
  0x1b   :  { %p1982_p10 = pnand %p1980_p9, %p1977_p8 }
  0x1d   :  { %1985 = shalt.err (!%p1982_p10)
}
  0x1e   :  { %s1986_s23 = scalar_lea.vmem %s2308_s20, 1024  ;;  %p1991_p12 = scmp.lt.s32.totalorder %s2308_s20, %s2308_s20 }
  0x1f   :  { %p1987_p11 = scmp.ne.s32.totalorder %s2308_s20, %s1986_s23  ;;  %p1992_p13 = scmp.lt.s32.totalorder %s1986_s23, %s1986_s23 }
  0x21   :  { %p1993_p0 = por %p1992_p13, %p1991_p12 }
  0x23   :  { %p1994_p1 = pnand %p1993_p0, %p1987_p11 }
  0x25   :  { %1997 = shalt.err (!%p1994_p1)
}
  0x26   :  { %70 = dma.hbm_to_vmem [thread:$0]  %s2935_s3, 1024, %s2308_s20, [#allocation9], %s2234_s29, %s2234_s29, %s2235_s30  }
  0x27   :  { %s2236_s24 = smov [#allocation11]   ;;  %s2237_s26 = smov [#allocation14]  }
  0x28   :  { %s89_s25 = sshll.u32 %s2236_s24, 4  ;;  %s109_s27 = sshll.u32 %s2237_s26, 4  ;;  %s90_s25 = int_to_ptr.vmem [resolvable:$true] %s89_s25  ;;  %s110_s27 = int_to_ptr.vmem [resolvable:$true] %s109_s27 }
  0x29   :  { %s1998_s13 = scalar_lea.hbm %s2937_s5, 16 }
  0x2a   :  { %p1999_p2 = scmp.ne.s32.totalorder %s2937_s5, %s1998_s13  ;;  %p2002_p3 = scmp.lt.u32.totalorder %s1998_s13, %s2937_s5 }
  0x2c   :  { %p2004_p4 = pnand %p2002_p3, %p1999_p2 }
  0x2e   :  { %2007 = shalt.err (!%p2004_p4)
}
  0x2f   :  { %s2008_s3 = scalar_lea.vmem %s90_s25, 16  ;;  %s2012_s20 = scalar_lea.vmem %s90_s25, 32 }
  0x30   :  { %p2009_p5 = scmp.ne.s32.totalorder %s90_s25, %s2008_s3  ;;  %p2013_p6 = scmp.lt.s32.totalorder %s90_s25, %s90_s25 }
  0x31   :  { %p2014_p7 = scmp.lt.s32.totalorder %s2012_s20, %s2008_s3 }
  0x33   :  { %p2015_p8 = por %p2014_p7, %p2013_p6 }
  0x35   :  { %p2016_p9 = pnand %p2015_p8, %p2009_p5 }
  0x37   :  { %2019 = shalt.err (!%p2016_p9)
}
  0x38   :  { %92 = dma.hbm_to_vmem [thread:$0]  %s2937_s5, 16, %s90_s25, [#allocation12]  }
  0x39   :  { %s2020_s1 = scalar_lea.hbm %s2939_s7, 16 }
  0x3a   :  { %p2021_p10 = scmp.ne.s32.totalorder %s2939_s7, %s2020_s1  ;;  %p2024_p11 = scmp.lt.u32.totalorder %s2020_s1, %s2939_s7 }
  0x3c   :  { %p2026_p12 = pnand %p2024_p11, %p2021_p10 }
  0x3e   :  { %2029 = shalt.err (!%p2026_p12)
}
  0x3f   :  { %s2030_s12 = scalar_lea.vmem %s110_s27, 16  ;;  %s2034_s13 = scalar_lea.vmem %s110_s27, 32 }
  0x40   :  { %p2031_p13 = scmp.ne.s32.totalorder %s110_s27, %s2030_s12  ;;  %p2035_p0 = scmp.lt.s32.totalorder %s110_s27, %s110_s27 }
  0x41   :  { %p2036_p1 = scmp.lt.s32.totalorder %s2034_s13, %s2030_s12 }
  0x43   :  { %p2037_p2 = por %p2036_p1, %p2035_p0 }
  0x45   :  { %p2038_p3 = pnand %p2037_p2, %p2031_p13 }
  0x47   :  { %2041 = shalt.err (!%p2038_p3)
}
  0x48   :  { %112 = dma.hbm_to_vmem [thread:$0]  %s2939_s7, 16, %s110_s27, [#allocation15]  }
  0x49   :  { %s2238_s14 = smov [#allocation17]   ;;  %s2239_s16 = smov [#allocation2]  }
  0x4a   :  { %s129_s15 = sshll.u32 %s2238_s14, 4  ;;  %s28_s17 = sshll.u32 %s2239_s16, 4  ;;  %s130_s15 = int_to_ptr.vmem [resolvable:$true] %s129_s15  ;;  %s2369_s17 = int_to_ptr.vmem [resolvable:$true] %s28_s17 }
  0x4b   :  { %s2042_s19 = scalar_lea.hbm %s2941_s9, 16 }
  0x4c   :  { %p2043_p4 = scmp.ne.s32.totalorder %s2941_s9, %s2042_s19  ;;  %p2046_p5 = scmp.lt.u32.totalorder %s2042_s19, %s2941_s9 }
  0x4e   :  { %p2048_p6 = pnand %p2046_p5, %p2043_p4 }
  0x50   :  { %2051 = shalt.err (!%p2048_p6)
}
  0x51   :  { %s2052_s7 = scalar_lea.vmem %s130_s15, 16  ;;  %s2056_s27 = scalar_lea.vmem %s130_s15, 32 }
  0x52   :  { %p2053_p7 = scmp.ne.s32.totalorder %s130_s15, %s2052_s7  ;;  %p2057_p8 = scmp.lt.s32.totalorder %s130_s15, %s130_s15 }
  0x53   :  { %p2058_p9 = scmp.lt.s32.totalorder %s2056_s27, %s2052_s7 }
  0x55   :  { %p2059_p10 = por %p2058_p9, %p2057_p8 }
  0x57   :  { %p2060_p11 = pnand %p2059_p10, %p2053_p7 }
  0x59   :  { %2063 = shalt.err (!%p2060_p11)
}
  0x5a   :  { %132 = dma.hbm_to_vmem [thread:$0]  %s2941_s9, 16, %s130_s15, [#allocation18]  }
  0x5b   :  { %s2064_s12 = scalar_lea.hbm %s2932_s0, 1024 }
  0x5c   :  { %p2065_p12 = scmp.ne.s32.totalorder %s2932_s0, %s2064_s12  ;;  %p2068_p13 = scmp.lt.u32.totalorder %s2064_s12, %s2932_s0 }
  0x5e   :  { %p2070_p0 = pnand %p2068_p13, %p2065_p12 }
  0x60   :  { %2073 = shalt.err (!%p2070_p0)
}
  0x61   :  { %s2074_s16 = scalar_lea.vmem %s2369_s17, 1024  ;;  %p2079_p2 = scmp.lt.s32.totalorder %s2369_s17, %s2369_s17 }
  0x62   :  { %p2075_p1 = scmp.ne.s32.totalorder %s2369_s17, %s2074_s16  ;;  %p2080_p3 = scmp.lt.s32.totalorder %s2074_s16, %s2074_s16 }
  0x64   :  { %p2081_p4 = por %p2080_p3, %p2079_p2 }
  0x66   :  { %p2082_p5 = pnand %p2081_p4, %p2075_p1 }
  0x68   :  { %2085 = shalt.err (!%p2082_p5)
}
  0x69   :  { %34 = dma.hbm_to_vmem [thread:$0]  %s2932_s0, 1024, %s2369_s17, [#allocation3], %s2234_s29, %s2234_s29, %s2235_s30  }
  0x6a   :  { %s2240_s3 = smov [#allocation7]   ;;  %s2241_s19 = smov [#allocation10]  }
  0x6b   :  { %s52_s20 = sshll.u32 %s2240_s3, 4  ;;  %s76_s21 = sshll.u32 %s2241_s19, 4  ;;  %s53_s20 = int_to_ptr.vmem [resolvable:$true] %s52_s20  ;;  %s2403_s21 = int_to_ptr.vmem [resolvable:$true] %s76_s21 }
  0x6c   :  { %s2086_s1 = scalar_lea.hbm %s2934_s2, 1024 }
  0x6d   :  { %p2087_p6 = scmp.ne.s32.totalorder %s2934_s2, %s2086_s1  ;;  %p2090_p7 = scmp.lt.u32.totalorder %s2086_s1, %s2934_s2 }
  0x6f   :  { %p2092_p8 = pnand %p2090_p7, %p2087_p6 }
  0x71   :  { %2095 = shalt.err (!%p2092_p8)
}
  0x72   :  { %s2096_s0 = scalar_lea.vmem %s53_s20, 1024  ;;  %p2101_p10 = scmp.lt.s32.totalorder %s53_s20, %s53_s20 }
  0x73   :  { %p2097_p9 = scmp.ne.s32.totalorder %s53_s20, %s2096_s0  ;;  %p2102_p11 = scmp.lt.s32.totalorder %s2096_s0, %s2096_s0 }
  0x75   :  { %p2103_p12 = por %p2102_p11, %p2101_p10 }
  0x77   :  { %p2104_p13 = pnand %p2103_p12, %p2097_p9 }
  0x79   :  { %2107 = shalt.err (!%p2104_p13)
}
  0x7a   :  { %58 = dma.hbm_to_vmem [thread:$0]  %s2934_s2, 1024, %s53_s20, [#allocation6], %s2234_s29, %s2234_s29, %s2235_s30  }
  0x7b   :  { %s2108_s13 = scalar_lea.hbm %s2936_s4, 1024 }
  0x7c   :  { %p2109_p0 = scmp.ne.s32.totalorder %s2936_s4, %s2108_s13  ;;  %p2112_p1 = scmp.lt.u32.totalorder %s2108_s13, %s2936_s4 }
  0x7e   :  { %p2114_p2 = pnand %p2112_p1, %p2109_p0 }
  0x80   :  { %2117 = shalt.err (!%p2114_p2)
}
  0x81   :  { %s2118_s9 = scalar_lea.vmem %s2403_s21, 1024  ;;  %p2123_p4 = scmp.lt.s32.totalorder %s2403_s21, %s2403_s21 }
  0x82   :  { %p2119_p3 = scmp.ne.s32.totalorder %s2403_s21, %s2118_s9  ;;  %p2124_p5 = scmp.lt.s32.totalorder %s2118_s9, %s2118_s9 }
  0x84   :  { %p2125_p6 = por %p2124_p5, %p2123_p4 }
  0x86   :  { %p2126_p7 = pnand %p2125_p6, %p2119_p3 }
  0x88   :  { %2129 = shalt.err (!%p2126_p7)
}
  0x89   :  { %82 = dma.hbm_to_vmem [thread:$0]  %s2936_s4, 1024, %s2403_s21, [#allocation9], %s2234_s29, %s2234_s29, %s2235_s30  }
  0x8a   :  { %s2242_s3 = smov [#allocation13]   ;;  %s2243_s19 = smov [#allocation16]  }
  0x8b   :  { %s99_s20 = sshll.u32 %s2242_s3, 4  ;;  %s119_s22 = sshll.u32 %s2243_s19, 4  ;;  %s100_s20 = int_to_ptr.vmem [resolvable:$true] %s99_s20  ;;  %s120_s22 = int_to_ptr.vmem [resolvable:$true] %s119_s22 }
  0x8c   :  { %s2130_s7 = scalar_lea.hbm %s2938_s6, 16 }
  0x8d   :  { %p2131_p8 = scmp.ne.s32.totalorder %s2938_s6, %s2130_s7  ;;  %p2134_p9 = scmp.lt.u32.totalorder %s2130_s7, %s2938_s6 }
  0x8f   :  { %p2136_p10 = pnand %p2134_p9, %p2131_p8 }
  0x91   :  { %2139 = shalt.err (!%p2136_p10)
}
  0x92   :  { %s2140_s4 = scalar_lea.vmem %s100_s20, 16  ;;  %s2144_s29 = scalar_lea.vmem %s100_s20, 32 }
  0x93   :  { %p2141_p11 = scmp.ne.s32.totalorder %s100_s20, %s2140_s4  ;;  %p2145_p12 = scmp.lt.s32.totalorder %s100_s20, %s100_s20 }
  0x94   :  { %p2146_p13 = scmp.lt.s32.totalorder %s2144_s29, %s2140_s4 }
  0x96   :  { %p2147_p0 = por %p2146_p13, %p2145_p12 }
  0x98   :  { %p2148_p1 = pnand %p2147_p0, %p2141_p11 }
  0x9a   :  { %2151 = shalt.err (!%p2148_p1)
}
  0x9b   :  { %102 = dma.hbm_to_vmem [thread:$0]  %s2938_s6, 16, %s100_s20, [#allocation12]  }
  0x9c   :  { %s2152_s28 = scalar_lea.hbm %s2940_s8, 16 }
  0x9d   :  { %p2153_p2 = scmp.ne.s32.totalorder %s2940_s8, %s2152_s28  ;;  %p2156_p3 = scmp.lt.u32.totalorder %s2152_s28, %s2940_s8 }
  0x9f   :  { %p2158_p4 = pnand %p2156_p3, %p2153_p2 }
  0xa1   :  { %2161 = shalt.err (!%p2158_p4)
}
  0xa2   :  { %s2162_s14 = scalar_lea.vmem %s120_s22, 16  ;;  %s2166_s16 = scalar_lea.vmem %s120_s22, 32 }
  0xa3   :  { %p2163_p5 = scmp.ne.s32.totalorder %s120_s22, %s2162_s14  ;;  %p2167_p6 = scmp.lt.s32.totalorder %s120_s22, %s120_s22 }
  0xa4   :  { %p2168_p7 = scmp.lt.s32.totalorder %s2166_s16, %s2162_s14 }
  0xa6   :  { %p2169_p8 = por %p2168_p7, %p2167_p6 }
  0xa8   :  { %p2170_p9 = pnand %p2169_p8, %p2163_p5 }
  0xaa   :  { %2173 = shalt.err (!%p2170_p9)
}
  0xab   :  { %122 = dma.hbm_to_vmem [thread:$0]  %s2940_s8, 16, %s120_s22, [#allocation15]  }
  0xac   :  { %s2244_s2 = smov [#allocation19]   ;;  %s2174_s19 = scalar_lea.hbm %s2942_s10, 16 }
  0xad   :  { %s139_s15 = sshll.u32 %s2244_s2, 4  ;;  %p2175_p10 = scmp.ne.s32.totalorder %s2942_s10, %s2174_s19  ;;  %s140_s15 = int_to_ptr.vmem [resolvable:$true] %s139_s15 }
  0xae   :  { %p2178_p11 = scmp.lt.u32.totalorder %s2174_s19, %s2942_s10 }
  0xb0   :  { %p2180_p12 = pnand %p2178_p11, %p2175_p10 }
  0xb2   :  { %2183 = shalt.err (!%p2180_p12)
}
  0xb3   :  { %s2184_s18 = scalar_lea.vmem %s140_s15, 16  ;;  %s2188_s8 = scalar_lea.vmem %s140_s15, 32 }
  0xb4   :  { %p2185_p13 = scmp.ne.s32.totalorder %s140_s15, %s2184_s18  ;;  %p2189_p0 = scmp.lt.s32.totalorder %s140_s15, %s140_s15 }
  0xb5   :  { %p2190_p1 = scmp.lt.s32.totalorder %s2188_s8, %s2184_s18 }
  0xb7   :  { %p2191_p2 = por %p2190_p1, %p2189_p0 }
  0xb9   :  { %p2192_p3 = pnand %p2191_p2, %p2185_p13 }
  0xbb   :  { %2195 = shalt.err (!%p2192_p3)
}
  0xbc   :  { %142 = dma.hbm_to_vmem [thread:$0]  %s2942_s10, 16, %s140_s15, [#allocation18]  }
  0xbd   :  { %2218 = dma.done.wait [#allocation3], 1024  }
  0xbe   :  { %2219 = vsyncadd [#allocation3], 4294966272 }
  0xbf   :  { %2220 = dma.done.wait [#allocation6], 2048  }
  0xc0   :  { %2221 = vsyncadd [#allocation6], 4294965248 }
  0xc1   :  { %2222 = dma.done.wait [#allocation9], 2048  }
  0xc2   :  { %2223 = vsyncadd [#allocation9], 4294965248 }
  0xc3   :  { %2224 = dma.done.wait [#allocation12], 32  }
  0xc4   :  { %2225 = vsyncadd [#allocation12], 4294967264 }
  0xc5   :  { %2226 = dma.done.wait [#allocation15], 32  }
  0xc6   :  { %2227 = vsyncadd [#allocation15], 4294967264 }
  0xc7   :  { %2228 = dma.done.wait [#allocation18], 32  }
  0xc8   :  { %2229 = vsyncadd [#allocation18], 4294967264  ;;  %v1747_v0 = vld [vmem:[#allocation5] sm:$0xff]   ;;  %v1748_v1 = vld [vmem:[#allocation5 + $0x8] sm:$0xff]   ;;  %s2245_s10 = smov [#allocation20]  }
  0xc9   :  { %1603 = vmatprep.subr.bf16.mxu0 %v1747_v0  ;;  %v1749_v2 = vld [vmem:[#allocation5 + $0x10] sm:$0xff]   ;;  %v1750_v3 = vld [vmem:[#allocation5 + $0x18] sm:$0xff]   ;;  %v1755_v4 = vld [vmem:[#allocation2] sm:$0xff]   ;;  %s1444_s0 = sshll.u32 %s2245_s10, 4  ;;  %s1445_s0 = int_to_ptr.vmem [resolvable:$true] %s1444_s0 }
  0xca   :  { %1604 = vmatpush3.bf16.msra.mxu0 %v1747_v0  ;;  %1619 = vmatprep.mubr.bf16.mxu0 %v1755_v4  ;;  %v1751_v5 = vld [vmem:[#allocation5 + $0x20] sm:$0xff]   ;;  %v1752_v6 = vld [vmem:[#allocation5 + $0x28] sm:$0xff]   ;;  %v1753_v7 = vld [vmem:[#allocation5 + $0x30] sm:$0xff]   ;;  %s2196_s4 = scalar_lea.vmem %s1445_s0, 2048  ;;  %p2201_p5 = scmp.lt.s32.totalorder %s1445_s0, %s1445_s0 }
  0xcb   :  { %1605 = vmatprep.subr.bf16.mxu0 %v1748_v1  ;;  %v1754_v8 = vld [vmem:[#allocation5 + $0x38] sm:$0xff]   ;;  %v1756_v9 = vld [vmem:[#allocation2 + $0x8] sm:$0xff]   ;;  %v1757_v10 = vld [vmem:[#allocation2 + $0x10] sm:$0xff]   ;;  %p2197_p4 = scmp.ne.s32.totalorder %s1445_s0, %s2196_s4  ;;  %p2202_p6 = scmp.lt.s32.totalorder %s2196_s4, %s2196_s4 }
  0xcc   :  { %v1758_v11 = vld [vmem:[#allocation2 + $0x18] sm:$0xff]   ;;  %v1759_v12 = vld [vmem:[#allocation2 + $0x20] sm:$0xff]   ;;  %v1760_v13 = vld [vmem:[#allocation2 + $0x28] sm:$0xff]  }
  0xcd   :  { %v1761_v14 = vld [vmem:[#allocation2 + $0x30] sm:$0xff]   ;;  %v1762_v15 = vld [vmem:[#allocation2 + $0x38] sm:$0xff]   ;;  %v2476_v16 = vld [vmem:[#allocation11] ss:$0 sm:$0xff]  ;;  %p2203_p7 = por %p2202_p6, %p2201_p5 }
  0xce   :  { %1606 = vmatpush3.bf16.msra.mxu0 %v1748_v1 }
  0xcf   :  { %1607 = vmatprep.subr.bf16.mxu0 %v1749_v2  ;;  %p2204_p8 = pnand %p2203_p7, %p2197_p4 }
  0xd2   :  { %1608 = vmatpush3.bf16.msra.mxu0 %v1749_v2 }
  0xd3   :  { %1609 = vmatprep.subr.bf16.mxu0 %v1750_v3 }
  0xd6   :  { %1610 = vmatpush3.bf16.msra.mxu0 %v1750_v3 }
  0xd7   :  { %1611 = vmatprep.subr.bf16.mxu0 %v1751_v5 }
  0xda   :  { %1612 = vmatpush3.bf16.msra.mxu0 %v1751_v5 }
  0xdb   :  { %1613 = vmatprep.subr.bf16.mxu0 %v1752_v6 }
  0xde   :  { %1614 = vmatpush3.bf16.msra.mxu0 %v1752_v6 }
  0xdf   :  { %1615 = vmatprep.subr.bf16.mxu0 %v1753_v7 }
  0xe2   :  { %1616 = vmatpush3.bf16.msra.mxu0 %v1753_v7 }
  0xe3   :  { %1617 = vmatprep.subr.bf16.mxu0 %v1754_v8 }
  0xe6   :  { %1618 = vmatpush3.bf16.msra.mxu0 %v1754_v8 }
  0xe9   :  { %1620 = vmatmul.mubr.bf16.vlgmr.msra.gmra.mrb[0].mxu0 %v1756_v9 }
  0xea   :  { %1623 = vmatprep.mubr.bf16.mxu0 %v1757_v10 }
  0xf1   :  { %1624 = vmatmul.mubr.bf16.gmra.mrb[4].mxu0 %v1758_v11 }
  0xf2   :  { %1627 = vmatprep.mubr.bf16.mxu0 %v1759_v12 }
  0xf9   :  { %1628 = vmatmul.mubr.bf16.gmra.mrb[8].mxu0 %v1760_v13 }
  0xfa   :  { %1631 = vmatprep.mubr.bf16.mxu0 %v1761_v14 }
 0x101   :  { %1632 = vmatmul.mubr.bf16.gmra.mrb[12].mxu0 %v1762_v15 }
 0x102   :  { %1683 = vmatprep.mubr.bf16.mxu0 %v1755_v4 }
 0x1bc   :  { %v1621_v17 = vpop.f32.mrb[0].mxu0 }
 0x1bd   :  { %v2479_v18 = vadd.f32 %v1621_v17, %v2476_v16  ;;  %v346_v19 = vpop.f32.mrb[1].mxu0  ;;  %v2540_v17 = vld [vmem:[#allocation19] ss:$0 sm:$0xff] }
 0x1be   :  { %v2482_v20 = vadd.f32 %v2476_v16, %v346_v19  ;;  %v1622_v21 = vpop.f32.mrb[2].mxu0 }
 0x1bf   :  { %v1480_v22 = vmul.f32 -1.442695, %v2479_v18  ;;  %v2486_v23 = vadd.f32 %v1622_v21, %v2476_v16  ;;  %v349_v24 = vpop.f32.mrb[3].mxu0 }
 0x1c0   :  { %v1478_v25 = vmul.f32 -1.442695, %v2482_v20  ;;  %v2490_v26 = vadd.f32 %v2476_v16, %v349_v24 }
 0x1c1   :  { %1787 = vpow2.f32 %v1480_v22  ;;  %v1481_v27 = vmul.f32 -1.442695, %v2486_v23 }
 0x1c2   :  { %1789 = vpow2.f32 %v1478_v25  ;;  %v1479_v28 = vmul.f32 -1.442695, %v2490_v26 }
 0x1c3   :  { %1791 = vpow2.f32 %v1481_v27 }
 0x1c4   :  { %1793 = vpow2.f32 %v1479_v28  ;;  %v1625_v29 = vpop.f32.mrb[4].mxu0 }
 0x1c5   :  { %v2495_v30 = vadd.f32 %v1625_v29, %v2476_v16  ;;  %v362_v31 = vpop.f32.mrb[5].mxu0 }
 0x1c6   :  { %v2498_v32 = vadd.f32 %v2476_v16, %v362_v31  ;;  %v1626_v33 = vpop.f32.mrb[6].mxu0 }
 0x1c7   :  { %v1484_v34 = vmul.f32 -1.442695, %v2495_v30  ;;  %v2502_v35 = vadd.f32 %v1626_v33, %v2476_v16  ;;  %v365_v36 = vpop.f32.mrb[7].mxu0 }
 0x1c8   :  { %v1482_v37 = vmul.f32 -1.442695, %v2498_v32  ;;  %v2506_v38 = vadd.f32 %v2476_v16, %v365_v36 }
 0x1c9   :  { %1795 = vpow2.f32 %v1484_v34  ;;  %v1485_v39 = vmul.f32 -1.442695, %v2502_v35 }
 0x1ca   :  { %1797 = vpow2.f32 %v1482_v37  ;;  %v1483_v40 = vmul.f32 -1.442695, %v2506_v38 }
 0x1cb   :  { %v1788_v41 = vpop.eup %1787  ;;  %1799 = vpow2.f32 %v1485_v39 }
 0x1cc   :  { %v1790_v42 = vpop.eup %1789  ;;  %v459_v43 = vadd.f32 1.0, %v1788_v41  ;;  %1801 = vpow2.f32 %v1483_v40  ;;  %v1629_v44 = vpop.f32.mrb[8].mxu0 }
 0x1cd   :  { %v1792_v45 = vpop.eup %1791  ;;  %v457_v46 = vadd.f32 1.0, %v1790_v42  ;;  %v2511_v47 = vadd.f32 %v1629_v44, %v2476_v16  ;;  %v378_v48 = vpop.f32.mrb[9].mxu0 }
 0x1ce   :  { %v1794_v49 = vpop.eup %1793  ;;  %1803 = vrcp.f32 %v459_v43  ;;  %v460_v50 = vadd.f32 1.0, %v1792_v45  ;;  %v2514_v51 = vadd.f32 %v2476_v16, %v378_v48  ;;  %v1630_v52 = vpop.f32.mrb[10].mxu0 }
 0x1cf   :  { %1805 = vrcp.f32 %v457_v46  ;;  %v458_v53 = vadd.f32 1.0, %v1794_v49  ;;  %v1488_v54 = vmul.f32 -1.442695, %v2511_v47  ;;  %v2518_v55 = vadd.f32 %v1630_v52, %v2476_v16  ;;  %v381_v56 = vpop.f32.mrb[11].mxu0 }
 0x1d0   :  { %1807 = vrcp.f32 %v460_v50  ;;  %v1486_v57 = vmul.f32 -1.442695, %v2514_v51  ;;  %v2522_v58 = vadd.f32 %v2476_v16, %v381_v56 }
 0x1d1   :  { %1809 = vrcp.f32 %v458_v53  ;;  %v1489_v59 = vmul.f32 -1.442695, %v2518_v55 }
 0x1d2   :  { %1811 = vpow2.f32 %v1488_v54  ;;  %v1487_v60 = vmul.f32 -1.442695, %v2522_v58 }
 0x1d3   :  { %v1796_v61 = vpop.eup %1795  ;;  %1813 = vpow2.f32 %v1486_v57 }
 0x1d4   :  { %v1798_v62 = vpop.eup %1797  ;;  %v463_v63 = vadd.f32 1.0, %v1796_v61  ;;  %1815 = vpow2.f32 %v1489_v59  ;;  %v1633_v0 = vpop.f32.mrb[12].mxu0 }
 0x1d5   :  { %v1800_v1 = vpop.eup %1799  ;;  %v461_v2 = vadd.f32 1.0, %v1798_v62  ;;  %1817 = vpow2.f32 %v1487_v60  ;;  %v2527_v3 = vadd.f32 %v1633_v0, %v2476_v16  ;;  %v394_v4 = vpop.f32.mrb[13].mxu0 }
 0x1d6   :  { %v1802_v5 = vpop.eup %1801  ;;  %1819 = vrcp.f32 %v463_v63  ;;  %v464_v6 = vadd.f32 1.0, %v1800_v1  ;;  %v2530_v7 = vadd.f32 %v2476_v16, %v394_v4  ;;  %v1634_v8 = vpop.f32.mrb[14].mxu0 }
 0x1d7   :  { %1821 = vrcp.f32 %v461_v2  ;;  %v462_v9 = vadd.f32 1.0, %v1802_v5  ;;  %v1492_v10 = vmul.f32 -1.442695, %v2527_v3  ;;  %v2534_v11 = vadd.f32 %v1634_v8, %v2476_v16  ;;  %v397_v12 = vpop.f32.mrb[15].mxu0 }
 0x1d8   :  { %v1804_v13 = vpop.eup %1803  ;;  %1823 = vrcp.f32 %v464_v6  ;;  %v1490_v14 = vmul.f32 -1.442695, %v2530_v7  ;;  %v2538_v15 = vadd.f32 %v2476_v16, %v397_v12 }
 0x1d9   :  { %v1806_v19 = vpop.eup %1805  ;;  %1825 = vrcp.f32 %v462_v9  ;;  %v1493_v21 = vmul.f32 -1.442695, %v2534_v11  ;;  %v2544_v22 = vmul.f32 %v1804_v13, %v2479_v18 }
 0x1da   :  { %v1808_v24 = vpop.eup %1807  ;;  %1827 = vpow2.f32 %v1492_v10  ;;  %v1491_v25 = vmul.f32 -1.442695, %v2538_v15  ;;  %v2548_v27 = vmul.f32 %v1806_v19, %v2482_v20 }
 0x1db   :  { %v1810_v28 = vpop.eup %1809  ;;  %v2551_v16 = vmul.f32 %v1808_v24, %v2486_v23  ;;  %1829 = vpow2.f32 %v1490_v14  ;;  %v532_v29 = vmul.f32 %v2540_v17, %v2544_v22 }
 0x1dc   :  { %v1812_v31 = vpop.eup %1811  ;;  %v2556_v33 = vmul.f32 %v1810_v28, %v2490_v26  ;;  %1831 = vpow2.f32 %v1493_v21  ;;  %v530_v18 = vmul.f32 %v2540_v17, %v2548_v27 }
 0x1dd   :  { %v1814_v34 = vpop.eup %1813  ;;  %v467_v36 = vadd.f32 1.0, %v1812_v31  ;;  %1833 = vpow2.f32 %v1491_v25  ;;  %550 = vadd.xlane.f32.xlu1 %v532_v29  ;;  %v533_v40 = vmul.f32 %v2540_v17, %v2551_v16 }
 0x1de   :  { %v1816_v20 = vpop.eup %1815  ;;  %v465_v37 = vadd.f32 1.0, %v1814_v34  ;;  %546 = vadd.xlane.f32.xlu0 %v530_v18  ;;  %v531_v42 = vmul.f32 %v2540_v17, %v2556_v33 }
 0x1df   :  { %v1818_v23 = vpop.eup %1817  ;;  %1835 = vrcp.f32 %v467_v36  ;;  %v468_v39 = vadd.f32 1.0, %v1816_v20 }
 0x1e0   :  { %v1820_v41 = vpop.eup %1819  ;;  %1837 = vrcp.f32 %v465_v37  ;;  %v466_v26 = vadd.f32 1.0, %v1818_v23 }
 0x1e1   :  { %v1822_v43 = vpop.eup %1821  ;;  %1839 = vrcp.f32 %v468_v39  ;;  %552 = vadd.xlane.f32.xlu1 %v533_v40  ;;  %v2568_v49 = vmul.f32 %v1820_v41, %v2495_v30 }
 0x1e2   :  { %v1824_v44 = vpop.eup %1823  ;;  %v2565_v45 = vmul.f32 %v1822_v43, %v2498_v32  ;;  %1841 = vrcp.f32 %v466_v26  ;;  %548 = vadd.xlane.f32.xlu0 %v531_v42 }
 0x1e3   :  { %v1826_v46 = vpop.eup %1825  ;;  %v2576_v57 = vmul.f32 %v1824_v44, %v2502_v35  ;;  %v536_v61 = vmul.f32 %v2540_v17, %v2568_v49 }
 0x1e4   :  { %v1828_v48 = vpop.eup %1827  ;;  %v2571_v50 = vmul.f32 %v1826_v46, %v2506_v38  ;;  %v534_v52 = vmul.f32 %v2540_v17, %v2565_v45 }
 0x1e5   :  { %v1830_v53 = vpop.eup %1829  ;;  %v471_v54 = vadd.f32 1.0, %v1828_v48  ;;  %v537_v35 = vmul.f32 %v2540_v17, %v2576_v57 }
 0x1e6   :  { %v1832_v56 = vpop.eup %1831  ;;  %v469_v32 = vadd.f32 1.0, %v1830_v53  ;;  %554 = vadd.xlane.f32.xlu0 %v534_v52  ;;  %v535_v59 = vmul.f32 %v2540_v17, %v2571_v50 }
 0x1e7   :  { %v1834_v60 = vpop.eup %1833  ;;  %1843 = vrcp.f32 %v471_v54  ;;  %v472_v30 = vadd.f32 1.0, %v1832_v56 }
 0x1e8   :  { %1845 = vrcp.f32 %v469_v32  ;;  %v470_v38 = vadd.f32 1.0, %v1834_v60  ;;  %556 = vadd.xlane.f32.xlu1 %v535_v59 }
 0x1e9   :  { %v1836_v62 = vpop.eup %1835  ;;  %1847 = vrcp.f32 %v472_v30 }
 0x1ea   :  { %v1838_v63 = vpop.eup %1837  ;;  %1849 = vrcp.f32 %v470_v38  ;;  %558 = vadd.xlane.f32.xlu0 %v536_v61  ;;  %v2588_v4 = vmul.f32 %v1836_v62, %v2511_v47 }
 0x1eb   :  { %v1840_v0 = vpop.eup %1839  ;;  %v2585_v1 = vmul.f32 %v1838_v63, %v2514_v51 }
 0x1ec   :  { %v1842_v2 = vpop.eup %1841  ;;  %560 = vadd.xlane.f32.xlu1 %v537_v35  ;;  %v2596_v8 = vmul.f32 %v1840_v0, %v2518_v55  ;;  %v540_v10 = vmul.f32 %v2540_v17, %v2588_v4 }
 0x1ed   :  { %v2591_v5 = vmul.f32 %v1842_v2, %v2522_v58  ;;  %v538_v6 = vmul.f32 %v2540_v17, %v2585_v1 }
 0x1ee   :  { %v541_v13 = vmul.f32 %v2540_v17, %v2596_v8 }
 0x1ef   :  { %562 = vadd.xlane.f32.xlu0 %v538_v6  ;;  %v539_v9 = vmul.f32 %v2540_v17, %v2591_v5 }
 0x1f1   :  { %v1844_v51 = vpop.eup %1843  ;;  %564 = vadd.xlane.f32.xlu1 %v539_v9 }
 0x1f2   :  { %v1846_v47 = vpop.eup %1845  ;;  %v2608_v14 = vmul.f32 %v1844_v51, %v2527_v3 }
 0x1f3   :  { %v1848_v12 = vpop.eup %1847  ;;  %v2603_v58 = vmul.f32 %v1846_v47, %v2530_v7  ;;  %566 = vadd.xlane.f32.xlu0 %v540_v10 }
 0x1f4   :  { %v1850_v55 = vpop.eup %1849  ;;  %v2616_v24 = vmul.f32 %v1848_v12, %v2534_v11  ;;  %v544_v25 = vmul.f32 %v2540_v17, %v2608_v14 }
 0x1f5   :  { %v2611_v19 = vmul.f32 %v1850_v55, %v2538_v15  ;;  %568 = vadd.xlane.f32.xlu1 %v541_v13  ;;  %v542_v21 = vmul.f32 %v2540_v17, %v2603_v58  ;;  %v1763_v15 = vld [vmem:[#allocation8] sm:$0xff]  }
 0x1f6   :  { %v545_v3 = vmul.f32 %v2540_v17, %v2616_v24  ;;  %1635 = vmatprep.subr.bf16.mxu1 %v1763_v15 }
 0x1f7   :  { %570 = vadd.xlane.f32.xlu0 %v542_v21  ;;  %v543_v7 = vmul.f32 %v2540_v17, %v2611_v19  ;;  %1636 = vmatpush3.bf16.msra.mxu1 %v1763_v15 }
 0x1f9   :  { %572 = vadd.xlane.f32.xlu1 %v543_v7 }
 0x1fb   :  { %574 = vadd.xlane.f32.xlu0 %v544_v25 }
 0x1fd   :  { %576 = vadd.xlane.f32.xlu1 %v545_v3 }
 0x26a   :  { %v551_v28 = vpop.xlane.xlu1 %550 }
 0x26b   :  { %v580_v29 = vmul.f32 0.03125, %v551_v28  ;;  %v547_v11 = vpop.xlane.xlu0 %546 }
 0x26c   :  { %v578_v31 = vmul.f32 0.03125, %v547_v11 }
 0x26d   :  { %v596_v18 = vsub.f32 %v2544_v22, %v580_v29 }
 0x26e   :  { %v594_v34 = vsub.f32 %v2548_v27, %v578_v31  ;;  %v553_v36 = vpop.xlane.xlu1 %552 }
 0x26f   :  { %v581_v20 = vmul.f32 0.03125, %v553_v36  ;;  %v549_v37 = vpop.xlane.xlu0 %548  ;;  %v2634_v42 = vmul.f32 %v2540_v17, %v596_v18 }
 0x270   :  { %v579_v23 = vmul.f32 0.03125, %v549_v37  ;;  %v2627_v39 = vmul.f32 %v2540_v17, %v594_v34 }
 0x271   :  { %v597_v40 = vsub.f32 %v2551_v16, %v581_v20  ;;  %v1765_v20 = vld [vmem:[#allocation8 + $0x10] sm:$0xff]  }
 0x272   :  { %v595_v41 = vsub.f32 %v2556_v33, %v579_v23  ;;  %v626_v26 = vmul.f32 %v2627_v39, %v2627_v39  ;;  %v628_v33 = vmul.f32 %v2634_v42, %v2634_v42 }
 0x273   :  { %v555_v22 = vpop.xlane.xlu0 %554  ;;  %v2640_v46 = vmul.f32 %v2540_v17, %v597_v40 }
 0x274   :  { %v582_v43 = vmul.f32 0.03125, %v555_v22  ;;  %642 = vadd.xlane.f32.xlu0 %v626_v26  ;;  %v2637_v27 = vmul.f32 %v2540_v17, %v595_v41 }
 0x275   :  { %v557_v44 = vpop.xlane.xlu1 %556 }
 0x276   :  { %v598_v16 = vsub.f32 %v2565_v45, %v582_v43  ;;  %v583_v48 = vmul.f32 0.03125, %v557_v44  ;;  %v627_v52 = vmul.f32 %v2637_v27, %v2637_v27  ;;  %v629_v45 = vmul.f32 %v2640_v46, %v2640_v46 }
 0x277   :  { %v559_v53 = vpop.xlane.xlu0 %558 }
 0x278   :  { %v599_v54 = vsub.f32 %v2571_v50, %v583_v48  ;;  %v584_v56 = vmul.f32 0.03125, %v559_v53  ;;  %646 = vadd.xlane.f32.xlu0 %v628_v33  ;;  %644 = vadd.xlane.f32.xlu1 %v627_v52  ;;  %v2649_v32 = vmul.f32 %v2540_v17, %v598_v16  ;;  %v1767_v53 = vld [vmem:[#allocation8 + $0x20] sm:$0xff]  }
 0x279   :  { %v561_v59 = vpop.xlane.xlu1 %560 }
 0x27a   :  { %v600_v60 = vsub.f32 %v2568_v49, %v584_v56  ;;  %v585_v30 = vmul.f32 0.03125, %v561_v59  ;;  %v630_v38 = vmul.f32 %v2649_v32, %v2649_v32  ;;  %v2657_v61 = vmul.f32 %v2540_v17, %v599_v54  ;;  %v1768_v54 = vld [vmem:[#allocation8 + $0x28] sm:$0xff]   ;;  %v1769_v56 = vld [vmem:[#allocation8 + $0x30] sm:$0xff]   ;;  %v1770_v59 = vld [vmem:[#allocation8 + $0x38] sm:$0xff]  }
 0x27c   :  { %v601_v50 = vsub.f32 %v2576_v57, %v585_v30  ;;  %v563_v62 = vpop.xlane.xlu0 %562  ;;  %648 = vadd.xlane.f32.xlu1 %v629_v45  ;;  %650 = vadd.xlane.f32.xlu0 %v630_v38  ;;  %v2661_v63 = vmul.f32 %v2540_v17, %v600_v60  ;;  %v631_v49 = vmul.f32 %v2657_v61, %v2657_v61 }
 0x27d   :  { %v586_v35 = vmul.f32 0.03125, %v563_v62 }
 0x27e   :  { %v565_v0 = vpop.xlane.xlu1 %564  ;;  %v632_v2 = vmul.f32 %v2661_v63, %v2661_v63  ;;  %v2668_v6 = vmul.f32 %v2540_v17, %v601_v50 }
 0x27f   :  { %v602_v9 = vsub.f32 %v2585_v1, %v586_v35  ;;  %v587_v57 = vmul.f32 0.03125, %v565_v0 }
 0x280   :  { %v567_v51 = vpop.xlane.xlu0 %566  ;;  %652 = vadd.xlane.f32.xlu1 %v631_v49  ;;  %654 = vadd.xlane.f32.xlu0 %v632_v2  ;;  %v633_v55 = vmul.f32 %v2668_v6, %v2668_v6 }
 0x281   :  { %v603_v10 = vsub.f32 %v2591_v5, %v587_v57  ;;  %v588_v47 = vmul.f32 0.03125, %v567_v51  ;;  %v2673_v12 = vmul.f32 %v2540_v17, %v602_v9  ;;  %v1764_v5 = vld [vmem:[#allocation8 + $0x8] sm:$0xff]  }
 0x282   :  { %v569_v13 = vpop.xlane.xlu1 %568  ;;  %1637 = vmatprep.subr.bf16.mxu1 %v1764_v5 }
 0x283   :  { %v604_v21 = vsub.f32 %v2588_v4, %v588_v47  ;;  %v589_v7 = vmul.f32 0.03125, %v569_v13  ;;  %v634_v1 = vmul.f32 %v2673_v12, %v2673_v12  ;;  %v2681_v25 = vmul.f32 %v2540_v17, %v603_v10  ;;  %1638 = vmatpush3.bf16.msra.mxu1 %v1764_v5 }
 0x284   :  { %v571_v3 = vpop.xlane.xlu0 %570  ;;  %656 = vadd.xlane.f32.xlu1 %v633_v55  ;;  %1639 = vmatprep.subr.bf16.mxu1 %v1765_v20 }
 0x285   :  { %v605_v15 = vsub.f32 %v2596_v8, %v589_v7  ;;  %v590_v28 = vmul.f32 0.03125, %v571_v3  ;;  %658 = vadd.xlane.f32.xlu0 %v634_v1  ;;  %v2685_v29 = vmul.f32 %v2540_v17, %v604_v21  ;;  %v635_v4 = vmul.f32 %v2681_v25, %v2681_v25 }
 0x286   :  { %v573_v11 = vpop.xlane.xlu1 %572 }
 0x287   :  { %v606_v31 = vsub.f32 %v2603_v58, %v590_v28  ;;  %v591_v18 = vmul.f32 0.03125, %v573_v11  ;;  %v636_v34 = vmul.f32 %v2685_v29, %v2685_v29  ;;  %v2693_v36 = vmul.f32 %v2540_v17, %v605_v15  ;;  %1640 = vmatpush3.bf16.msra.mxu1 %v1765_v20  ;;  %v2720_v15 = vld [vmem:[#allocation14] ss:$0 sm:$0xff] }
 0x288   :  { %v575_v8 = vpop.xlane.xlu0 %574  ;;  %660 = vadd.xlane.f32.xlu1 %v635_v4 }
 0x289   :  { %v607_v37 = vsub.f32 %v2611_v19, %v591_v18  ;;  %v592_v23 = vmul.f32 0.03125, %v575_v8  ;;  %662 = vadd.xlane.f32.xlu0 %v636_v34  ;;  %v2697_v40 = vmul.f32 %v2540_v17, %v606_v31  ;;  %v637_v58 = vmul.f32 %v2693_v36, %v2693_v36  ;;  %v1766_v19 = vld [vmem:[#allocation8 + $0x18] sm:$0xff]  }
 0x28a   :  { %v577_v41 = vpop.xlane.xlu1 %576  ;;  %1641 = vmatprep.subr.bf16.mxu1 %v1766_v19 }
 0x28b   :  { %v608_v26 = vsub.f32 %v2608_v14, %v592_v23  ;;  %v593_v22 = vmul.f32 0.03125, %v577_v41  ;;  %v638_v43 = vmul.f32 %v2697_v40, %v2697_v40  ;;  %v2705_v44 = vmul.f32 %v2540_v17, %v607_v37  ;;  %1642 = vmatpush3.bf16.msra.mxu1 %v1766_v19  ;;  %v2724_v41 = vld [vmem:[#allocation16] ss:$0 sm:$0xff] }
 0x28c   :  { %664 = vadd.xlane.f32.xlu1 %v637_v58  ;;  %1643 = vmatprep.subr.bf16.mxu1 %v1767_v53 }
 0x28d   :  { %v609_v16 = vsub.f32 %v2616_v24, %v593_v22  ;;  %666 = vadd.xlane.f32.xlu0 %v638_v43  ;;  %v2709_v48 = vmul.f32 %v2540_v17, %v608_v26  ;;  %v639_v33 = vmul.f32 %v2705_v44, %v2705_v44 }
 0x28f   :  { %v640_v14 = vmul.f32 %v2709_v48, %v2709_v48  ;;  %v2716_v52 = vmul.f32 %v2540_v17, %v609_v16  ;;  %1644 = vmatpush3.bf16.msra.mxu1 %v1767_v53 }
 0x290   :  { %668 = vadd.xlane.f32.xlu1 %v639_v33  ;;  %1645 = vmatprep.subr.bf16.mxu1 %v1768_v54 }
 0x291   :  { %670 = vadd.xlane.f32.xlu0 %v640_v14  ;;  %v641_v24 = vmul.f32 %v2716_v52, %v2716_v52 }
 0x293   :  { %1646 = vmatpush3.bf16.msra.mxu1 %v1768_v54 }
 0x294   :  { %672 = vadd.xlane.f32.xlu1 %v641_v24  ;;  %1647 = vmatprep.subr.bf16.mxu1 %v1769_v56 }
 0x297   :  { %1648 = vmatpush3.bf16.msra.mxu1 %v1769_v56 }
 0x298   :  { %1649 = vmatprep.subr.bf16.mxu1 %v1770_v59 }
 0x29b   :  { %1650 = vmatpush3.bf16.msra.mxu1 %v1770_v59 }
 0x301   :  { %v643_v17 = vpop.xlane.xlu0 %642 }
 0x302   :  { %v674_v45 = vmul.f32 0.03125, %v643_v17 }
 0x304   :  { %v690_v60 = vadd.f32 1e-05, %v674_v45 }
 0x305   :  { %v645_v30 = vpop.xlane.xlu1 %644  ;;  %v647_v38 = vpop.xlane.xlu0 %646 }
 0x306   :  { %1851 = vrsqrt.f32 %v690_v60  ;;  %v675_v50 = vmul.f32 0.03125, %v645_v30  ;;  %v676_v62 = vmul.f32 0.03125, %v647_v38 }
 0x308   :  { %v691_v35 = vadd.f32 1e-05, %v675_v50  ;;  %v692_v0 = vadd.f32 1e-05, %v676_v62 }
 0x309   :  { %v649_v49 = vpop.xlane.xlu1 %648  ;;  %v651_v2 = vpop.xlane.xlu0 %650 }
 0x30a   :  { %1853 = vrsqrt.f32 %v691_v35  ;;  %v677_v9 = vmul.f32 0.03125, %v649_v49  ;;  %v678_v57 = vmul.f32 0.03125, %v651_v2 }
 0x30b   :  { %1855 = vrsqrt.f32 %v692_v0 }
 0x30c   :  { %v693_v51 = vadd.f32 1e-05, %v677_v9  ;;  %v694_v10 = vadd.f32 1e-05, %v678_v57 }
 0x30d   :  { %v653_v47 = vpop.xlane.xlu1 %652  ;;  %v655_v13 = vpop.xlane.xlu0 %654 }
 0x30e   :  { %1857 = vrsqrt.f32 %v693_v51  ;;  %v679_v55 = vmul.f32 0.03125, %v653_v47  ;;  %v680_v21 = vmul.f32 0.03125, %v655_v13 }
 0x30f   :  { %1859 = vrsqrt.f32 %v694_v10 }
 0x310   :  { %v1852_v7 = vpop.eup %1851  ;;  %v695_v1 = vadd.f32 1e-05, %v679_v55  ;;  %v696_v3 = vadd.f32 1e-05, %v680_v21 }
 0x311   :  { %v657_v5 = vpop.xlane.xlu1 %656  ;;  %v722_v28 = vmul.f32 %v1852_v7, %v2627_v39 }
 0x312   :  { %1861 = vrsqrt.f32 %v695_v1  ;;  %v681_v11 = vmul.f32 0.03125, %v657_v5  ;;  %v659_v4 = vpop.xlane.xlu0 %658 }
 0x313   :  { %1863 = vrsqrt.f32 %v696_v3  ;;  %v682_v31 = vmul.f32 0.03125, %v659_v4  ;;  %v744_v8 = vmul.f32 %v2720_v15, %v722_v28 }
 0x314   :  { %v1854_v18 = vpop.eup %1853  ;;  %v697_v34 = vadd.f32 1e-05, %v681_v11 }
 0x315   :  { %v1856_v20 = vpop.eup %1855  ;;  %v698_v37 = vadd.f32 1e-05, %v682_v31  ;;  %v661_v23 = vpop.xlane.xlu1 %660  ;;  %v723_v58 = vmul.f32 %v1854_v18, %v2637_v27  ;;  %v766_v14 = vadd.f32 %v2724_v41, %v744_v8 }
 0x316   :  { %1865 = vrsqrt.f32 %v697_v34  ;;  %v683_v26 = vmul.f32 0.03125, %v661_v23  ;;  %v663_v22 = vpop.xlane.xlu0 %662  ;;  %v724_v39 = vmul.f32 %v1856_v20, %v2634_v42 }
 0x317   :  { %1867 = vrsqrt.f32 %v698_v37  ;;  %v684_v43 = vmul.f32 0.03125, %v663_v22  ;;  %v745_v19 = vmul.f32 %v2720_v15, %v723_v58 }
 0x318   :  { %v1858_v16 = vpop.eup %1857  ;;  %v699_v33 = vadd.f32 1e-05, %v683_v26  ;;  %v746_v59 = vmul.f32 %v2720_v15, %v724_v39 }
 0x319   :  { %v1860_v53 = vpop.eup %1859  ;;  %v700_v24 = vadd.f32 1e-05, %v684_v43  ;;  %v665_v54 = vpop.xlane.xlu1 %664  ;;  %v767_v56 = vadd.f32 %v2724_v41, %v745_v19  ;;  %v725_v27 = vmul.f32 %v1858_v16, %v2640_v46 }
 0x31a   :  { %1869 = vrsqrt.f32 %v699_v33  ;;  %v685_v17 = vmul.f32 0.03125, %v665_v54  ;;  %v667_v42 = vpop.xlane.xlu0 %666  ;;  %v726_v45 = vmul.f32 %v1860_v53, %v2649_v32  ;;  %v768_v46 = vadd.f32 %v2724_v41, %v746_v59 }
 0x31b   :  { %1871 = vrsqrt.f32 %v700_v24  ;;  %v686_v60 = vmul.f32 0.03125, %v667_v42  ;;  %v782_v30 = vpack.c.bf16 %v767_v56, %v766_v14  ;;  %v747_v38 = vmul.f32 %v2720_v15, %v725_v27 }
 0x31c   :  { %v1862_v50 = vpop.eup %1861  ;;  %v701_v62 = vadd.f32 1e-05, %v685_v17  ;;  %v748_v35 = vmul.f32 %v2720_v15, %v726_v45 }
 0x31d   :  { %v1864_v0 = vpop.eup %1863  ;;  %v702_v49 = vadd.f32 1e-05, %v686_v60  ;;  %v669_v2 = vpop.xlane.xlu1 %668  ;;  %1651 = vmatprep.mubr.bf16.mxu1 %v782_v30  ;;  %v769_v9 = vadd.f32 %v2724_v41, %v747_v38  ;;  %v727_v57 = vmul.f32 %v1862_v50, %v2657_v61 }
 0x31e   :  { %1873 = vrsqrt.f32 %v701_v62  ;;  %v687_v32 = vmul.f32 0.03125, %v669_v2  ;;  %v671_v51 = vpop.xlane.xlu0 %670  ;;  %v728_v10 = vmul.f32 %v1864_v0, %v2661_v63  ;;  %v770_v1 = vadd.f32 %v2724_v41, %v748_v35  ;;  %v1771_v2 = vld [vmem:[#allocation10] sm:$0xff]  }
 0x31f   :  { %1875 = vrsqrt.f32 %v702_v49  ;;  %v688_v47 = vmul.f32 0.03125, %v671_v51  ;;  %v783_v13 = vpack.c.bf16 %v769_v9, %v768_v46  ;;  %v749_v55 = vmul.f32 %v2720_v15, %v727_v57  ;;  %1699 = vmatprep.subr.bf16.mxu1 %v1771_v2  ;;  %v1772_v46 = vld [vmem:[#allocation10 + $0x8] sm:$0xff]   ;;  %v1773_v9 = vld [vmem:[#allocation10 + $0x10] sm:$0xff]   ;;  %v1779_v51 = vld [vmem:[#allocation7] sm:$0xff]  }
 0x320   :  { %v1866_v21 = vpop.eup %1865  ;;  %v703_v7 = vadd.f32 1e-05, %v687_v32  ;;  %v750_v4 = vmul.f32 %v2720_v15, %v728_v10  ;;  %v1776_v57 = vld [vmem:[#allocation10 + $0x28] sm:$0xff]   ;;  %v1778_v32 = vld [vmem:[#allocation10 + $0x38] sm:$0xff]  }
 0x321   :  { %v1868_v3 = vpop.eup %1867  ;;  %v704_v5 = vadd.f32 1e-05, %v688_v47  ;;  %v673_v28 = vpop.xlane.xlu1 %672  ;;  %1652 = vmatmul.mubr.bf16.vlgmr.msra.gmra.mrb[0].mxu1 %v783_v13  ;;  %v771_v61 = vadd.f32 %v2724_v41, %v749_v55  ;;  %v729_v11 = vmul.f32 %v1866_v21, %v2668_v6  ;;  %v1780_v10 = vld [vmem:[#allocation7 + $0x8] sm:$0xff]   ;;  %v1781_v47 = vld [vmem:[#allocation7 + $0x10] sm:$0xff]   ;;  %v1782_v13 = vld [vmem:[#allocation7 + $0x18] sm:$0xff]  }
 0x322   :  { %1877 = vrsqrt.f32 %v703_v7  ;;  %v689_v63 = vmul.f32 0.03125, %v673_v28  ;;  %v730_v31 = vmul.f32 %v1868_v3, %v2673_v12  ;;  %v772_v23 = vadd.f32 %v2724_v41, %v750_v4  ;;  %1700 = vmatpush3.bf16.msra.mxu1 %v1771_v2  ;;  %v1783_v55 = vld [vmem:[#allocation7 + $0x20] sm:$0xff]   ;;  %v1784_v21 = vld [vmem:[#allocation7 + $0x28] sm:$0xff]   ;;  %v1785_v7 = vld [vmem:[#allocation7 + $0x30] sm:$0xff]  }
 0x323   :  { %1879 = vrsqrt.f32 %v704_v5  ;;  %v784_v18 = vpack.c.bf16 %v771_v61, %v770_v1  ;;  %v751_v34 = vmul.f32 %v2720_v15, %v729_v11  ;;  %1701 = vmatprep.subr.bf16.mxu1 %v1772_v46  ;;  %v1786_v1 = vld [vmem:[#allocation7 + $0x38] sm:$0xff]  }
 0x324   :  { %v1870_v8 = vpop.eup %1869  ;;  %v705_v20 = vadd.f32 1e-05, %v689_v63  ;;  %v752_v26 = vmul.f32 %v2720_v15, %v730_v31 }
 0x325   :  { %v1872_v37 = vpop.eup %1871  ;;  %1655 = vmatprep.mubr.bf16.mxu1 %v784_v18  ;;  %v773_v58 = vadd.f32 %v2724_v41, %v751_v34  ;;  %v731_v6 = vmul.f32 %v1870_v8, %v2681_v25 }
 0x326   :  { %1881 = vrsqrt.f32 %v705_v20  ;;  %v732_v22 = vmul.f32 %v1872_v37, %v2685_v29  ;;  %v774_v16 = vadd.f32 %v2724_v41, %v752_v26  ;;  %1702 = vmatpush3.bf16.msra.mxu1 %v1772_v46 }
 0x327   :  { %v785_v12 = vpack.c.bf16 %v773_v58, %v772_v23  ;;  %v753_v39 = vmul.f32 %v2720_v15, %v731_v6  ;;  %1703 = vmatprep.subr.bf16.mxu1 %v1773_v9 }
 0x328   :  { %v1874_v43 = vpop.eup %1873  ;;  %v754_v53 = vmul.f32 %v2720_v15, %v732_v22 }
 0x329   :  { %v1876_v19 = vpop.eup %1875  ;;  %1656 = vmatmul.mubr.bf16.gmra.mrb[4].mxu1 %v785_v12  ;;  %v775_v33 = vadd.f32 %v2724_v41, %v753_v39  ;;  %v733_v14 = vmul.f32 %v1874_v43, %v2693_v36 }
 0x32a   :  { %v734_v25 = vmul.f32 %v1876_v19, %v2697_v40  ;;  %v776_v27 = vadd.f32 %v2724_v41, %v754_v53  ;;  %1704 = vmatpush3.bf16.msra.mxu1 %v1773_v9  ;;  %v1948_v53 = vld [vmem:[#allocation2 + $0x10] sm:$0xff]  }
 0x32b   :  { %v786_v24 = vpack.c.bf16 %v775_v33, %v774_v16  ;;  %v755_v54 = vmul.f32 %v2720_v15, %v733_v14  ;;  %v1947_v14 = vld [vmem:[#allocation2 + $0x8] sm:$0xff]  }
 0x32c   :  { %v1878_v29 = vpop.eup %1877  ;;  %v756_v42 = vmul.f32 %v2720_v15, %v734_v25  ;;  %v1949_v25 = vld [vmem:[#allocation2 + $0x18] sm:$0xff]  }
 0x32d   :  { %v1880_v56 = vpop.eup %1879  ;;  %1659 = vmatprep.mubr.bf16.mxu1 %v786_v24  ;;  %v777_v59 = vadd.f32 %v2724_v41, %v755_v54  ;;  %v735_v17 = vmul.f32 %v1878_v29, %v2705_v44  ;;  %v1950_v24 = vld [vmem:[#allocation2 + $0x20] sm:$0xff]   ;;  %v1951_v54 = vld [vmem:[#allocation2 + $0x28] sm:$0xff]   ;;  %v1952_v29 = vld [vmem:[#allocation2 + $0x30] sm:$0xff]  }
 0x32e   :  { %v736_v36 = vmul.f32 %v1880_v56, %v2709_v48  ;;  %v778_v30 = vadd.f32 %v2724_v41, %v756_v42  ;;  %v1953_v56 = vld [vmem:[#allocation2 + $0x38] sm:$0xff]  }
 0x32f   :  { %v787_v45 = vpack.c.bf16 %v777_v59, %v776_v27  ;;  %v757_v60 = vmul.f32 %v2720_v15, %v735_v17 }
 0x330   :  { %v1882_v40 = vpop.eup %1881  ;;  %v758_v62 = vmul.f32 %v2720_v15, %v736_v36 }
 0x331   :  { %1660 = vmatmul.mubr.bf16.gmra.mrb[8].mxu1 %v787_v45  ;;  %v779_v38 = vadd.f32 %v2724_v41, %v757_v60  ;;  %v737_v50 = vmul.f32 %v1882_v40, %v2716_v52  ;;  %v1774_v52 = vld [vmem:[#allocation10 + $0x18] sm:$0xff]  }
 0x332   :  { %v780_v0 = vadd.f32 %v2724_v41, %v758_v62  ;;  %1705 = vmatprep.subr.bf16.mxu1 %v1774_v52 }
 0x333   :  { %v788_v35 = vpack.c.bf16 %v779_v38, %v778_v30  ;;  %v759_v44 = vmul.f32 %v2720_v15, %v737_v50  ;;  %1706 = vmatpush3.bf16.msra.mxu1 %v1774_v52  ;;  %v1775_v15 = vld [vmem:[#allocation10 + $0x20] sm:$0xff]  }
 0x334   :  { %1707 = vmatprep.subr.bf16.mxu1 %v1775_v15 }
 0x335   :  { %1663 = vmatprep.mubr.bf16.mxu1 %v788_v35  ;;  %v781_v48 = vadd.f32 %v2724_v41, %v759_v44  ;;  %v1777_v41 = vld [vmem:[#allocation10 + $0x30] sm:$0xff]  }
 0x337   :  { %v789_v49 = vpack.c.bf16 %v781_v48, %v780_v0  ;;  %1708 = vmatpush3.bf16.msra.mxu1 %v1775_v15 }
 0x338   :  { %1709 = vmatprep.subr.bf16.mxu1 %v1776_v57 }
 0x339   :  { %1664 = vmatmul.mubr.bf16.gmra.mrb[12].mxu1 %v789_v49  ;;  %v2804_v49 = vld [vmem:[#allocation13] ss:$0 sm:$0xff] }
 0x33a   :  { %1715 = vmatprep.mubr.bf16.mxu1 %v1779_v51 }
 0x33b   :  { %1710 = vmatpush3.bf16.msra.mxu1 %v1776_v57 }
 0x33c   :  { %1711 = vmatprep.subr.bf16.mxu1 %v1777_v41 }
 0x33f   :  { %1712 = vmatpush3.bf16.msra.mxu1 %v1777_v41 }
 0x340   :  { %1713 = vmatprep.subr.bf16.mxu1 %v1778_v32 }
 0x343   :  { %1714 = vmatpush3.bf16.msra.mxu1 %v1778_v32 }
 0x346   :  { %1716 = vmatmul.mubr.bf16.vlgmr.msra.gmra.mrb[16].mxu1 %v1780_v10 }
 0x347   :  { %1719 = vmatprep.mubr.bf16.mxu1 %v1781_v47 }
 0x34e   :  { %1720 = vmatmul.mubr.bf16.gmra.mrb[20].mxu1 %v1782_v13 }
 0x34f   :  { %1723 = vmatprep.mubr.bf16.mxu1 %v1783_v55 }
 0x356   :  { %1724 = vmatmul.mubr.bf16.gmra.mrb[24].mxu1 %v1784_v21 }
 0x357   :  { %1727 = vmatprep.mubr.bf16.mxu1 %v1785_v7 }
 0x35e   :  { %1728 = vmatmul.mubr.bf16.gmra.mrb[28].mxu1 %v1786_v1 }
 0x3f4   :  { %v1653_v3 = vpop.f32.mrb[0].mxu1 }
 0x3f5   :  { %v888_v5 = vpop.f32.mrb[1].mxu1 }
 0x3f6   :  { %v1654_v28 = vpop.f32.mrb[2].mxu1 }
 0x3f7   :  { %v952_v61 = vpack.c.bf16 %v1654_v28, %v1653_v3  ;;  %v891_v11 = vpop.f32.mrb[3].mxu1 }
 0x3f8   :  { %v951_v4 = vpack.c.bf16 %v891_v11, %v888_v5 }
 0x3fa   :  { %1667 = vmatprep.subr.bf16.mxu0 %v951_v4 }
 0x3fb   :  { %1668 = vmatpush3.bf16.msra.mxu0 %v951_v4 }
 0x3fc   :  { %v1657_v63 = vpop.f32.mrb[4].mxu1  ;;  %1669 = vmatprep.subr.bf16.mxu0 %v952_v61 }
 0x3fd   :  { %v904_v31 = vpop.f32.mrb[5].mxu1 }
 0x3fe   :  { %v1658_v18 = vpop.f32.mrb[6].mxu1 }
 0x3ff   :  { %v954_v34 = vpack.c.bf16 %v1658_v18, %v1657_v63  ;;  %v907_v8 = vpop.f32.mrb[7].mxu1  ;;  %1670 = vmatpush3.bf16.msra.mxu0 %v952_v61 }
 0x400   :  { %v953_v20 = vpack.c.bf16 %v907_v8, %v904_v31 }
 0x402   :  { %1671 = vmatprep.subr.bf16.mxu0 %v953_v20 }
 0x403   :  { %1672 = vmatpush3.bf16.msra.mxu0 %v953_v20 }
 0x404   :  { %v1661_v37 = vpop.f32.mrb[8].mxu1  ;;  %1673 = vmatprep.subr.bf16.mxu0 %v954_v34 }
 0x405   :  { %v920_v23 = vpop.f32.mrb[9].mxu1 }
 0x406   :  { %v1662_v58 = vpop.f32.mrb[10].mxu1 }
 0x407   :  { %v956_v6 = vpack.c.bf16 %v1662_v58, %v1661_v37  ;;  %v923_v26 = vpop.f32.mrb[11].mxu1  ;;  %1674 = vmatpush3.bf16.msra.mxu0 %v954_v34 }
 0x408   :  { %v955_v22 = vpack.c.bf16 %v923_v26, %v920_v23 }
 0x40a   :  { %1675 = vmatprep.subr.bf16.mxu0 %v955_v22 }
 0x40b   :  { %1676 = vmatpush3.bf16.msra.mxu0 %v955_v22 }
 0x40c   :  { %v1665_v12 = vpop.f32.mrb[12].mxu1  ;;  %1677 = vmatprep.subr.bf16.mxu0 %v956_v6 }
 0x40d   :  { %v936_v39 = vpop.f32.mrb[13].mxu1 }
 0x40e   :  { %v1666_v43 = vpop.f32.mrb[14].mxu1 }
 0x40f   :  { %v958_v19 = vpack.c.bf16 %v1666_v43, %v1665_v12  ;;  %v939_v16 = vpop.f32.mrb[15].mxu1  ;;  %1678 = vmatpush3.bf16.msra.mxu0 %v956_v6 }
 0x410   :  { %v957_v33 = vpack.c.bf16 %v939_v16, %v936_v39 }
 0x412   :  { %1679 = vmatprep.subr.bf16.mxu0 %v957_v33 }
 0x413   :  { %1680 = vmatpush3.bf16.msra.mxu0 %v957_v33 }
 0x414   :  { %1681 = vmatprep.subr.bf16.mxu0 %v958_v19 }
 0x417   :  { %1682 = vmatpush3.bf16.msra.mxu0 %v958_v19 }
 0x419   :  { %v2772_v27 = vpop.f32.mrb[16].mxu1 }
 0x41a   :  { %1684 = vmatmul.mubr.bf16.vlgmr.msra.gmra.mrb[16].mxu0 %v1947_v14  ;;  %v2774_v59 = vpop.f32.mrb[17].mxu1 }
 0x41b   :  { %1687 = vmatprep.mubr.bf16.mxu0 %v1948_v53  ;;  %v2776_v17 = vpop.f32.mrb[18].mxu1 }
 0x41c   :  { %v2778_v42 = vpop.f32.mrb[19].mxu1 }
 0x421   :  { %v2780_v36 = vpop.f32.mrb[20].mxu1 }
 0x422   :  { %1688 = vmatmul.mubr.bf16.gmra.mrb[20].mxu0 %v1949_v25  ;;  %v2782_v45 = vpop.f32.mrb[21].mxu1 }
 0x423   :  { %1691 = vmatprep.mubr.bf16.mxu0 %v1950_v24  ;;  %v2784_v60 = vpop.f32.mrb[22].mxu1 }
 0x424   :  { %v2786_v40 = vpop.f32.mrb[23].mxu1 }
 0x429   :  { %v2788_v30 = vpop.f32.mrb[24].mxu1 }
 0x42a   :  { %1692 = vmatmul.mubr.bf16.gmra.mrb[24].mxu0 %v1951_v54  ;;  %v2790_v38 = vpop.f32.mrb[25].mxu1 }
 0x42b   :  { %1695 = vmatprep.mubr.bf16.mxu0 %v1952_v29  ;;  %v2792_v50 = vpop.f32.mrb[26].mxu1  ;;  %v2854_v29 = vld [vmem:[#allocation17] ss:$0 sm:$0xff] }
 0x42c   :  { %v2794_v62 = vpop.f32.mrb[27].mxu1 }
 0x431   :  { %v2796_v35 = vpop.f32.mrb[28].mxu1 }
 0x432   :  { %1696 = vmatmul.mubr.bf16.gmra.mrb[28].mxu0 %v1953_v56  ;;  %v2798_v44 = vpop.f32.mrb[29].mxu1 }
 0x433   :  { %v2800_v0 = vpop.f32.mrb[30].mxu1 }
 0x434   :  { %v2802_v48 = vpop.f32.mrb[31].mxu1 }
 0x4ed   :  { %v1685_v2 = vpop.f32.mrb[16].mxu0 }
 0x4ee   :  { %v2807_v46 = vadd.f32 %v1685_v2, %v2804_v49  ;;  %v1000_v9 = vpop.f32.mrb[17].mxu0 }
 0x4ef   :  { %v2810_v52 = vadd.f32 %v2804_v49, %v1000_v9  ;;  %v1686_v15 = vpop.f32.mrb[18].mxu0 }
 0x4f0   :  { %v1508_v57 = vmul.f32 -1.442695, %v2807_v46  ;;  %v2814_v41 = vadd.f32 %v1686_v15, %v2804_v49  ;;  %v1003_v32 = vpop.f32.mrb[19].mxu0 }
 0x4f1   :  { %v1506_v51 = vmul.f32 -1.442695, %v2810_v52  ;;  %v2818_v10 = vadd.f32 %v2804_v49, %v1003_v32 }
 0x4f2   :  { %1883 = vpow2.f32 %v1508_v57  ;;  %v1509_v47 = vmul.f32 -1.442695, %v2814_v41 }
 0x4f3   :  { %1885 = vpow2.f32 %v1506_v51  ;;  %v1507_v13 = vmul.f32 -1.442695, %v2818_v10 }
 0x4f4   :  { %1887 = vpow2.f32 %v1509_v47 }
 0x4f5   :  { %1889 = vpow2.f32 %v1507_v13  ;;  %v1689_v55 = vpop.f32.mrb[20].mxu0 }
 0x4f6   :  { %v2823_v21 = vadd.f32 %v1689_v55, %v2804_v49  ;;  %v1016_v7 = vpop.f32.mrb[21].mxu0 }
 0x4f7   :  { %v2826_v1 = vadd.f32 %v2804_v49, %v1016_v7  ;;  %v1690_v3 = vpop.f32.mrb[22].mxu0 }
 0x4f8   :  { %v1512_v5 = vmul.f32 -1.442695, %v2823_v21  ;;  %v2830_v28 = vadd.f32 %v1690_v3, %v2804_v49  ;;  %v1019_v61 = vpop.f32.mrb[23].mxu0  ;;  %v1353_v3 = vadd.f32 %v2772_v27, %v2854_v29 }
 0x4f9   :  { %v1510_v11 = vmul.f32 -1.442695, %v2826_v1  ;;  %v2834_v4 = vadd.f32 %v2804_v49, %v1019_v61 }
 0x4fa   :  { %1891 = vpow2.f32 %v1512_v5  ;;  %v1513_v63 = vmul.f32 -1.442695, %v2830_v28 }
 0x4fb   :  { %1893 = vpow2.f32 %v1510_v11  ;;  %v1511_v31 = vmul.f32 -1.442695, %v2834_v4 }
 0x4fc   :  { %v1884_v18 = vpop.eup %1883  ;;  %1895 = vpow2.f32 %v1513_v63 }
 0x4fd   :  { %v1886_v34 = vpop.eup %1885  ;;  %v1113_v8 = vadd.f32 1.0, %v1884_v18  ;;  %1897 = vpow2.f32 %v1511_v31  ;;  %v1693_v20 = vpop.f32.mrb[24].mxu0 }
 0x4fe   :  { %v1888_v37 = vpop.eup %1887  ;;  %v1111_v23 = vadd.f32 1.0, %v1886_v34  ;;  %v2839_v58 = vadd.f32 %v1693_v20, %v2804_v49  ;;  %v1032_v6 = vpop.f32.mrb[25].mxu0 }
 0x4ff   :  { %v1890_v26 = vpop.eup %1889  ;;  %1899 = vrcp.f32 %v1113_v8  ;;  %v1114_v22 = vadd.f32 1.0, %v1888_v37  ;;  %v2842_v12 = vadd.f32 %v2804_v49, %v1032_v6  ;;  %v1694_v39 = vpop.f32.mrb[26].mxu0  ;;  %v1345_v8 = vadd.f32 %v2854_v29, %v2774_v59 }
 0x500   :  { %1901 = vrcp.f32 %v1111_v23  ;;  %v1112_v43 = vadd.f32 1.0, %v1890_v26  ;;  %v1516_v19 = vmul.f32 -1.442695, %v2839_v58  ;;  %v2846_v16 = vadd.f32 %v1694_v39, %v2804_v49  ;;  %v1035_v33 = vpop.f32.mrb[27].mxu0 }
 0x501   :  { %1903 = vrcp.f32 %v1114_v22  ;;  %v1514_v14 = vmul.f32 -1.442695, %v2842_v12  ;;  %v2850_v53 = vadd.f32 %v2804_v49, %v1035_v33  ;;  %v1356_v59 = vadd.f32 %v2776_v17, %v2854_v29 }
 0x502   :  { %1905 = vrcp.f32 %v1112_v43  ;;  %v1517_v25 = vmul.f32 -1.442695, %v2846_v16  ;;  %v1348_v33 = vadd.f32 %v2854_v29, %v2778_v42  ;;  %v1361_v42 = vadd.f32 %v2854_v29, %v2782_v45 }
 0x503   :  { %1907 = vpow2.f32 %v1516_v19  ;;  %v1515_v24 = vmul.f32 -1.442695, %v2850_v53  ;;  %v1364_v45 = vadd.f32 %v2854_v29, %v2786_v40  ;;  %v1377_v40 = vadd.f32 %v2854_v29, %v2790_v38 }
 0x504   :  { %v1892_v54 = vpop.eup %1891  ;;  %1909 = vpow2.f32 %v1514_v14  ;;  %v1380_v38 = vadd.f32 %v2854_v29, %v2794_v62 }
 0x505   :  { %v1894_v56 = vpop.eup %1893  ;;  %v1117_v2 = vadd.f32 1.0, %v1892_v54  ;;  %1911 = vpow2.f32 %v1517_v25  ;;  %v1697_v9 = vpop.f32.mrb[28].mxu0 }
 0x506   :  { %v1896_v15 = vpop.eup %1895  ;;  %v1115_v57 = vadd.f32 1.0, %v1894_v56  ;;  %1913 = vpow2.f32 %v1515_v24  ;;  %v2857_v32 = vadd.f32 %v1697_v9, %v2804_v49  ;;  %v1048_v51 = vpop.f32.mrb[29].mxu0 }
 0x507   :  { %v1898_v47 = vpop.eup %1897  ;;  %1915 = vrcp.f32 %v1117_v2  ;;  %v1118_v13 = vadd.f32 1.0, %v1896_v15  ;;  %v2860_v55 = vadd.f32 %v2804_v49, %v1048_v51  ;;  %v1698_v7 = vpop.f32.mrb[30].mxu0 }
 0x508   :  { %1917 = vrcp.f32 %v1115_v57  ;;  %v1116_v5 = vadd.f32 1.0, %v1898_v47  ;;  %v1520_v61 = vmul.f32 -1.442695, %v2857_v32  ;;  %v2866_v11 = vadd.f32 %v1698_v7, %v2804_v49  ;;  %v1051_v63 = vpop.f32.mrb[31].mxu0 }
 0x509   :  { %v1900_v31 = vpop.eup %1899  ;;  %1919 = vrcp.f32 %v1118_v13  ;;  %v1518_v18 = vmul.f32 -1.442695, %v2860_v55  ;;  %v2870_v34 = vadd.f32 %v2804_v49, %v1051_v63 }
 0x50a   :  { %v1902_v20 = vpop.eup %1901  ;;  %v1161_v27 = vmul.f32 %v1900_v31, %v2807_v46  ;;  %1921 = vrcp.f32 %v1116_v5  ;;  %v1521_v37 = vmul.f32 -1.442695, %v2866_v11 }
 0x50b   :  { %v1904_v23 = vpop.eup %1903  ;;  %v1159_v6 = vmul.f32 %v1902_v20, %v2810_v52  ;;  %1923 = vpow2.f32 %v1520_v61  ;;  %v1519_v26 = vmul.f32 -1.442695, %v2870_v34 }
 0x50c   :  { %v1906_v22 = vpop.eup %1905  ;;  %v1162_v39 = vmul.f32 %v1904_v23, %v2814_v41  ;;  %1925 = vpow2.f32 %v1518_v18  ;;  %v1409_v49 = vadd.f32 %v1353_v3, %v1161_v27 }
 0x50d   :  { %v1908_v43 = vpop.eup %1907  ;;  %v1160_v46 = vmul.f32 %v1906_v22, %v2818_v10  ;;  %1927 = vpow2.f32 %v1521_v37  ;;  %v1407_v19 = vadd.f32 %v1345_v8, %v1159_v6  ;;  %v1369_v10 = vadd.f32 %v2780_v36, %v2854_v29 }
 0x50e   :  { %v1910_v52 = vpop.eup %1909  ;;  %v1121_v14 = vadd.f32 1.0, %v1908_v43  ;;  %1425 = vst [vmem:[#allocation20 + $0x10] sm:$0xff] %v1409_v49  ;;  %1929 = vpow2.f32 %v1519_v26  ;;  %v1410_v25 = vadd.f32 %v1356_v59, %v1162_v39  ;;  %v1372_v36 = vadd.f32 %v2784_v60, %v2854_v29 }
 0x50f   :  { %v1912_v24 = vpop.eup %1911  ;;  %v1119_v41 = vadd.f32 1.0, %v1910_v52  ;;  %1423 = vst [vmem:[#allocation20] sm:$0xff] %v1407_v19  ;;  %v1408_v54 = vadd.f32 %v1348_v33, %v1160_v46  ;;  %v1388_v43 = vadd.f32 %v2792_v50, %v2854_v29 }
 0x510   :  { %v1914_v56 = vpop.eup %1913  ;;  %1931 = vrcp.f32 %v1121_v14  ;;  %v1122_v17 = vadd.f32 1.0, %v1912_v24  ;;  %1426 = vst [vmem:[#allocation20 + $0x18] sm:$0xff] %v1410_v25 }
 0x511   :  { %v1916_v2 = vpop.eup %1915  ;;  %1933 = vrcp.f32 %v1119_v41  ;;  %v1120_v9 = vadd.f32 1.0, %v1914_v56  ;;  %1424 = vst [vmem:[#allocation20 + $0x8] sm:$0xff] %v1408_v54 }
 0x512   :  { %v1918_v15 = vpop.eup %1917  ;;  %v1165_v57 = vmul.f32 %v1916_v2, %v2823_v21  ;;  %1935 = vrcp.f32 %v1122_v17 }
 0x513   :  { %v1920_v51 = vpop.eup %1919  ;;  %v1163_v47 = vmul.f32 %v1918_v15, %v2826_v1  ;;  %1937 = vrcp.f32 %v1120_v9 }
 0x514   :  { %v1922_v13 = vpop.eup %1921  ;;  %v1166_v7 = vmul.f32 %v1920_v51, %v2830_v28  ;;  %v1413_v3 = vadd.f32 %v1369_v10, %v1165_v57 }
 0x515   :  { %v1924_v5 = vpop.eup %1923  ;;  %v1164_v61 = vmul.f32 %v1922_v13, %v2834_v4  ;;  %v1411_v63 = vadd.f32 %v1361_v42, %v1163_v47  ;;  %v1385_v4 = vadd.f32 %v2788_v30, %v2854_v29 }
 0x516   :  { %v1926_v21 = vpop.eup %1925  ;;  %v1125_v31 = vadd.f32 1.0, %v1924_v5  ;;  %1429 = vst [vmem:[#allocation20 + $0x30] sm:$0xff] %v1413_v3  ;;  %v1414_v18 = vadd.f32 %v1372_v36, %v1166_v7 }
 0x517   :  { %v1928_v1 = vpop.eup %1927  ;;  %v1123_v8 = vadd.f32 1.0, %v1926_v21  ;;  %1427 = vst [vmem:[#allocation20 + $0x20] sm:$0xff] %v1411_v63  ;;  %v1412_v20 = vadd.f32 %v1364_v45, %v1164_v61 }
 0x518   :  { %v1930_v28 = vpop.eup %1929  ;;  %1939 = vrcp.f32 %v1125_v31  ;;  %v1126_v27 = vadd.f32 1.0, %v1928_v1  ;;  %1430 = vst [vmem:[#allocation20 + $0x38] sm:$0xff] %v1414_v18 }
 0x519   :  { %1941 = vrcp.f32 %v1123_v8  ;;  %v1124_v60 = vadd.f32 1.0, %v1930_v28  ;;  %1428 = vst [vmem:[#allocation20 + $0x28] sm:$0xff] %v1412_v20 }
 0x51a   :  { %v1932_v37 = vpop.eup %1931  ;;  %1943 = vrcp.f32 %v1126_v27 }
 0x51b   :  { %v1934_v23 = vpop.eup %1933  ;;  %v1169_v6 = vmul.f32 %v1932_v37, %v2839_v58  ;;  %1945 = vrcp.f32 %v1124_v60 }
 0x51c   :  { %v1936_v26 = vpop.eup %1935  ;;  %v1167_v22 = vmul.f32 %v1934_v23, %v2842_v12  ;;  %v1401_v12 = vadd.f32 %v2796_v35, %v2854_v29  ;;  %v1404_v35 = vadd.f32 %v2800_v0, %v2854_v29 }
 0x51d   :  { %v1938_v39 = vpop.eup %1937  ;;  %v1170_v49 = vmul.f32 %v1936_v26, %v2846_v16  ;;  %v1417_v59 = vadd.f32 %v1385_v4, %v1169_v6  ;;  %v1393_v16 = vadd.f32 %v2854_v29, %v2798_v44  ;;  %v1396_v44 = vadd.f32 %v2854_v29, %v2802_v48 }
 0x51e   :  { %v1168_v30 = vmul.f32 %v1938_v39, %v2850_v53  ;;  %v1415_v46 = vadd.f32 %v1377_v40, %v1167_v22 }
 0x51f   :  { %1433 = vst [vmem:[#allocation20 + $0x50] sm:$0xff] %v1417_v59  ;;  %v1418_v19 = vadd.f32 %v1388_v43, %v1170_v49 }
 0x520   :  { %1431 = vst [vmem:[#allocation20 + $0x40] sm:$0xff] %v1415_v46  ;;  %v1416_v58 = vadd.f32 %v1380_v38, %v1168_v30 }
 0x521   :  { %1434 = vst [vmem:[#allocation20 + $0x58] sm:$0xff] %v1418_v19 }
 0x522   :  { %v1940_v33 = vpop.eup %1939  ;;  %1432 = vst [vmem:[#allocation20 + $0x48] sm:$0xff] %v1416_v58 }
 0x523   :  { %v1942_v50 = vpop.eup %1941  ;;  %v1173_v53 = vmul.f32 %v1940_v33, %v2857_v32 }
 0x524   :  { %v1944_v52 = vpop.eup %1943  ;;  %v1171_v14 = vmul.f32 %v1942_v50, %v2860_v55 }
 0x525   :  { %v1946_v62 = vpop.eup %1945  ;;  %v1174_v25 = vmul.f32 %v1944_v52, %v2866_v11  ;;  %v1421_v24 = vadd.f32 %v1401_v12, %v1173_v53 }
 0x526   :  { %v1172_v41 = vmul.f32 %v1946_v62, %v2870_v34  ;;  %v1419_v54 = vadd.f32 %v1393_v16, %v1171_v14 }
 0x527   :  { %1437 = vst [vmem:[#allocation20 + $0x70] sm:$0xff] %v1421_v24  ;;  %v1422_v32 = vadd.f32 %v1404_v35, %v1174_v25 }
 0x528   :  { %1435 = vst [vmem:[#allocation20 + $0x60] sm:$0xff] %v1419_v54  ;;  %v1420_v55 = vadd.f32 %v1396_v44, %v1172_v41 }
 0x529   :  { %1438 = vst [vmem:[#allocation20 + $0x78] sm:$0xff] %v1422_v32 }
 0x52a   :  { %1436 = vst [vmem:[#allocation20 + $0x68] sm:$0xff] %v1420_v55 }
 0x52b   :  { %2207 = shalt.err (!%p2204_p8)
}
 0x52c   :  { %s2208_s21 = scalar_lea.hbm %s2943_s11, 2048 }
 0x52d   :  { %p2209_p9 = scmp.ne.s32.totalorder %s2943_s11, %s2208_s21  ;;  %p2212_p10 = scmp.lt.u32.totalorder %s2208_s21, %s2943_s11 }
 0x52f   :  { %p2214_p11 = pnand %p2212_p10, %p2209_p9 }
 0x531   :  { %2217 = shalt.err (!%p2214_p11)
}
 0x532   :  { %s2246_s13 = smov 128   ;;  %s2247_s5 = smov 8  }
 0x533   :  { %1450 = dma.vmem_to_hbm [thread:$0]  %s1445_s0, 2048, %s2943_s11, [#allocation4], %s2246_s13, %s2246_s13, %s2247_s5  }
 0x534   :  { %2230 = dma.done.wait [#allocation4], 2048  }
 0x535   :  { %2231 = vsyncadd [#allocation4], 4294965248 }
 0x536   :  { %1454 = vsyncpa [#allocation3], 1 }
 0x537   :  { %1455 = vsyncpa [#allocation6], 1 }
 0x538   :  { %1456 = vsyncpa [#allocation9], 1 }
 0x539   :  { %1457 = vsyncpa [#allocation12], 1 }
 0x53a   :  { %1458 = vsyncpa [#allocation15], 1 }
 0x53b   :  { %1459 = vsyncpa [#allocation18], 1 }
 0x53c   :  { %1460 = vsyncpa [#allocation4], 1 }

</bundles_post_ra>
